<compile_context>
chip_gen: v7x
topology: tpu7x:2x2x1
jax: 0.10.0
libtpu: 0.0.40
codegen_flags: <defaults>
</compile_context>

<pallas_src>
import functools

import jax
import jax.numpy as jnp
from jax.experimental import pallas as pl
from jax.experimental.pallas import tpu as pltpu

NUM_CLASS_LANES = 128  # 9-class head padded to one full 128-lane vreg width.
OUT_DIM = 9
VMEM_LIMIT = 32 * 1024 * 1024


def _round_up(x, m):
    return ((x + m - 1) // m) * m


# ---------------------------------------------------------------------------
# Kernel 1 (fused): stem 3x3 stride-2 conv + SiLU  ->  depthwise 3x3 + SiLU.
#
# im2col for the stride-2 conv is built *inside* the kernel from 4 stride-2
# phase planes of the padded bf16 input (HBM sees the input exactly once), and
# collapsed into a single K=27 MXU matmul.  The stem activation is written
# with a 1-pixel zero halo into a VMEM f32 scratch only; the depthwise conv +
# SiLU reads that scratch and the kernel stores a single halo-free bf16 block.
# ---------------------------------------------------------------------------
def _stem_dw_kernel(p00_ref, p01_ref, p10_ref, p11_ref,
                    sw_ref, sb_ref, dw_w_ref, dw_b_ref, o_ref, halo_ref):
    _, ho, wo, cout = o_ref.shape
    cin = p00_ref.shape[-1]
    # phase[dy%2][dx%2] : (Ho+1, Wo+1, Cin) stride-2 sub-grids of padded input.
    phases = ((p00_ref[0], p01_ref[0]),
              (p10_ref[0], p11_ref[0]))

    # ---- stem: one K = 9*Cin matmul on the MXU (f32 accumulation) ----------
    taps = []
    for k in range(9):                      # 9 taps, fully unrolled at trace
        ky, kx = divmod(k, 3)
        ph = phases[ky % 2][kx % 2]
        tap = ph[ky // 2:ky // 2 + ho, kx // 2:kx // 2 + wo, :]   # (Ho,Wo,Cin)
        taps.append(tap.reshape(ho * wo, cin))
    patch = jnp.concatenate(taps, axis=-1)                        # (Ho*Wo, 9*Cin) bf16
    acc = jnp.dot(patch, sw_ref[...], preferred_element_type=jnp.float32)
    acc = acc + sb_ref[...]
    acc = acc * jax.nn.sigmoid(acc)                               # SiLU in f32

    # ---- write haloed activation into VMEM scratch (never hits HBM) --------
    # Halo is re-zeroed every step so correctness does not depend on which
    # TensorCore ran step 0 under megacore sharding (cheap: VMEM-only stores).
    halo_ref[...] = jnp.zeros_like(halo_ref)
    halo_ref[1:1 + ho, 1:1 + wo, :] = acc.reshape(ho, wo, cout)

    # ---- depthwise 3x3 + SiLU on the VMEM-resident haloed block -------------
    xpad = halo_ref[...]                                          # (Ho+2,Wo+2,C) f32
    dw = dw_w_ref[...]                                            # (9, C) f32
    out = jnp.zeros((ho, wo, cout), jnp.float32)
    for k in range(9):
        ky, kx = divmod(k, 3)
        out = out + xpad[ky:ky + ho, kx:kx + wo, :] * dw[k]
    out = out + dw_b_ref[0]
    out = out * jax.nn.sigmoid(out)                               # SiLU in f32
    o_ref[...] = out[None].astype(o_ref.dtype)                    # bf16 -> MXU next


# ---------------------------------------------------------------------------
# Kernel 2 (fused tail): pointwise 1x1 conv + SiLU -> head 1x1 conv + SiLU ->
# global average pool (accumulated over HW grid tiles, XLU reduce) ->
# Dropout(identity, eval) -> Linear -> Softmax(dim=1), all in one pass.
# Output is lane-padded to 128 classes; the wrapper slices back to OUT_DIM.
# ---------------------------------------------------------------------------
def _tail_kernel(y_ref, pw_w_ref, pw_b_ref, hd_w_ref, hd_b_ref,
                 fc_w_ref, fc_b_ref, o_ref, acc_ref, *, hw, hw_tile, mask_tail):
    t = pl.program_id(1)

    @pl.when(t == 0)
    def _():
        acc_ref[...] = jnp.zeros_like(acc_ref)

    y = y_ref[0]                                               # (hw_tile, C) bf16
    z = jnp.dot(y, pw_w_ref[...], preferred_element_type=jnp.float32)
    z = z + pw_b_ref[...]
    z = z * jax.nn.sigmoid(z)                                  # SiLU in f32
    z = jnp.dot(z.astype(jnp.bfloat16), hd_w_ref[...],
                preferred_element_type=jnp.float32)
    z = z + hd_b_ref[...]
    z = z * jax.nn.sigmoid(z)                                  # (hw_tile, F) f32

    if mask_tail:
        # Zero rows beyond the true spatial extent (padded tail tile).
        row = t * hw_tile + jax.lax.broadcasted_iota(jnp.int32, (hw_tile, 1), 0)
        z = jnp.where(row < hw, z, 0.0)

    # Partial GAP via cross-sublane reduce (XLU slot, MXU stays free).
    acc_ref[...] += jnp.sum(z, axis=0, keepdims=True)

    @pl.when(t == pl.num_programs(1) - 1)
    def _():
        feat = acc_ref[...] * (1.0 / hw)                       # (1, F) mean
        # Dropout(p=0.5) is the identity in eval mode.
        logits = jnp.dot(feat.astype(jnp.bfloat16), fc_w_ref[...],
                         preferred_element_type=jnp.float32) + fc_b_ref[...]
        m = jnp.max(logits, axis=-1, keepdims=True)
        e = jnp.exp(logits - m)                 # padded lanes: exp(-1e30-m) == 0
        probs = e / jnp.sum(e, axis=-1, keepdims=True)         # exact divide
        o_ref[...] = probs.reshape(1, 1, -1).astype(o_ref.dtype)


# ---------------------------------------------------------------------------
# Parameters (prepared once: bf16 MXU operands, fc padded to 128 lanes)
# ---------------------------------------------------------------------------
def init_params(key, cin=3, c_stem=128, c_mid=256, feat=256, out_dim=OUT_DIM):
    ks = jax.random.split(key, 5)

    def dense(k, fan_in, shape):
        return jax.random.normal(k, shape, jnp.float32) / jnp.sqrt(float(fan_in))

    stem_w = dense(ks[0], 9 * cin, (9, cin, c_stem)).reshape(9 * cin, c_stem)
    fc_w = dense(ks[4], feat, (feat, out_dim))
    fc_w_pad = jnp.zeros((feat, NUM_CLASS_LANES), jnp.float32).at[:, :out_dim].set(fc_w)
    # -1e30 bias (kept in f32, added post-matmul) makes pad lanes softmax to 0.
    fc_b_pad = jnp.full((1, NUM_CLASS_LANES), -1e30, jnp.float32).at[0, :out_dim].set(0.0)

    return {
        "stem_w": stem_w.astype(jnp.bfloat16),          # (9*Cin, c_stem)
        "stem_b": jnp.zeros((1, c_stem), jnp.float32),
        "dw_w": dense(ks[1], 9, (9, c_stem)),           # f32 (VPU work)
        "dw_b": jnp.zeros((1, c_stem), jnp.float32),
        "pw_w": dense(ks[2], c_stem, (c_stem, c_mid)).astype(jnp.bfloat16),
        "pw_b": jnp.zeros((1, c_mid), jnp.float32),
        "hd_w": dense(ks[3], c_mid, (c_mid, feat)).astype(jnp.bfloat16),
        "hd_b": jnp.zeros((1, feat), jnp.float32),
        "fc_w": fc_w_pad.astype(jnp.bfloat16),          # (feat, 128) padded
        "fc_b": fc_b_pad,                               # f32, -1e30 pad lanes
    }


# ---------------------------------------------------------------------------
# Forward
# ---------------------------------------------------------------------------
def efficientnet_forward(params, x_nchw):
    # NCHW (PyTorch) -> NHWC (TPU lane = channels); bf16 once at the boundary.
    x = jnp.transpose(x_nchw, (0, 2, 3, 1)).astype(jnp.bfloat16)
    B, H, W, Cin = x.shape
    assert H % 2 == 0 and W % 2 == 0
    Ho, Wo = (H + 2 - 3) // 2 + 1, (W + 2 - 3) // 2 + 1

    c_stem = params["dw_w"].shape[1]
    c_mid = params["pw_w"].shape[1]
    feat = params["hd_w"].shape[1]

    # ---- Stem: stride-2 phase split (1x input bytes, not 9x im2col) --------
    xp = jnp.pad(x, ((0, 0), (1, 1), (1, 1), (0, 0)))
    p00, p01 = xp[:, 0::2, 0::2, :], xp[:, 0::2, 1::2, :]
    p10, p11 = xp[:, 1::2, 0::2, :], xp[:, 1::2, 1::2, :]
    Hp, Wp = p00.shape[1], p00.shape[2]

    phase_spec = pl.BlockSpec((1, Hp, Wp, Cin), lambda b: (b, 0, 0, 0))
    y = pl.pallas_call(
        _stem_dw_kernel,
        out_shape=jax.ShapeDtypeStruct((B, Ho, Wo, c_stem), jnp.bfloat16),
        grid=(B,),
        in_specs=[phase_spec, phase_spec, phase_spec, phase_spec,
                  pl.BlockSpec((9 * Cin, c_stem), lambda b: (0, 0)),
                  pl.BlockSpec((1, c_stem), lambda b: (0, 0)),
                  pl.BlockSpec((9, c_stem), lambda b: (0, 0)),
                  pl.BlockSpec((1, c_stem), lambda b: (0, 0))],
        out_specs=pl.BlockSpec((1, Ho, Wo, c_stem), lambda b: (b, 0, 0, 0)),
        scratch_shapes=[pltpu.VMEM((Ho + 2, Wo + 2, c_stem), jnp.float32)],
        compiler_params=pltpu.CompilerParams(
            dimension_semantics=("parallel",),
            vmem_limit_bytes=VMEM_LIMIT),
    )(p00, p01, p10, p11,
      params["stem_w"], params["stem_b"], params["dw_w"], params["dw_b"])

    # ---- Fused tail: pw conv + head conv + GAP + Linear + Softmax ----------
    hw = Ho * Wo
    hw_tile = min(1024, _round_up(hw, 8))
    hw_pad = _round_up(hw, hw_tile)
    y2 = y.reshape(B, hw, c_stem)
    if hw_pad != hw:
        y2 = jnp.pad(y2, ((0, 0), (0, hw_pad - hw), (0, 0)))
    num_t = hw_pad // hw_tile

    out = pl.pallas_call(
        functools.partial(_tail_kernel, hw=hw, hw_tile=hw_tile,
                          mask_tail=(hw_pad != hw)),
        out_shape=jax.ShapeDtypeStruct((B, 1, NUM_CLASS_LANES), jnp.float32),
        grid=(B, num_t),
        in_specs=[
            pl.BlockSpec((1, hw_tile, c_stem), lambda b, t: (b, t, 0)),
            pl.BlockSpec((c_stem, c_mid), lambda b, t: (0, 0)),
            pl.BlockSpec((1, c_mid), lambda b, t: (0, 0)),
            pl.BlockSpec((c_mid, feat), lambda b, t: (0, 0)),
            pl.BlockSpec((1, feat), lambda b, t: (0, 0)),
            pl.BlockSpec((feat, NUM_CLASS_LANES), lambda b, t: (0, 0)),
            pl.BlockSpec((1, NUM_CLASS_LANES), lambda b, t: (0, 0)),
        ],
        out_specs=pl.BlockSpec((1, 1, NUM_CLASS_LANES), lambda b, t: (b, 0, 0)),
        scratch_shapes=[pltpu.VMEM((1, feat), jnp.float32)],
        compiler_params=pltpu.CompilerParams(
            dimension_semantics=("parallel", "arbitrary"),
            vmem_limit_bytes=VMEM_LIMIT),
    )(y2, params["pw_w"], params["pw_b"], params["hd_w"], params["hd_b"],
      params["fc_w"], params["fc_b"])

    return out[:, 0, :OUT_DIM]


if __name__ == "__main__":
    key = jax.random.PRNGKey(0)
    pkey, xkey = jax.random.split(key)
    params = init_params(pkey)
    x = jax.random.normal(xkey, (2, 3, 16, 16), jnp.float32)  # NCHW, like PyTorch

    probs = jax.jit(efficientnet_forward)(params, x)
    probs = jax.block_until_ready(probs)

    assert probs.shape == (2, OUT_DIM)
    assert bool(jnp.all(jnp.isfinite(probs)))
    assert bool(jnp.allclose(jnp.sum(probs, axis=1), 1.0, atol=1e-5))
    print("KERNEL_OK")
</pallas_src>

<mosaic_0001>
module attributes {stable_mosaic.version = 11 : i64} {
  func.func @_tail_kernel(%arg0: i32, %arg1: i32, %arg2: memref<1x64x128xbf16, #tpu.memory_space<vmem>>, %arg3: memref<128x256xbf16, #tpu.memory_space<vmem>>, %arg4: memref<1x256xf32, #tpu.memory_space<vmem>>, %arg5: memref<256x256xbf16, #tpu.memory_space<vmem>>, %arg6: memref<1x256xf32, #tpu.memory_space<vmem>>, %arg7: memref<256x128xbf16, #tpu.memory_space<vmem>>, %arg8: memref<1x128xf32, #tpu.memory_space<vmem>>, %arg9: memref<1x1x128xf32, #tpu.memory_space<vmem>>, %arg10: memref<1x256xf32, #tpu.memory_space<vmem>>) attributes {dimension_semantics = [#tpu.dimension_semantics<parallel>, #tpu.dimension_semantics<arbitrary>], iteration_bounds = array<i64: 2, 1>, scalar_prefetch = 0 : i64, scratch_operands = 1 : i64, tpu.core_type = #tpu.core_type<tc>, window_params = [{transform_indices = @transform_0, window_bounds = array<i64: 1, 64, 128>}, {pipeline_mode = #tpu.pipeline_mode<synchronous>, transform_indices = @transform_1, window_bounds = array<i64: 128, 256>}, {pipeline_mode = #tpu.pipeline_mode<synchronous>, transform_indices = @transform_2, window_bounds = array<i64: 1, 256>}, {pipeline_mode = #tpu.pipeline_mode<synchronous>, transform_indices = @transform_3, window_bounds = array<i64: 256, 256>}, {pipeline_mode = #tpu.pipeline_mode<synchronous>, transform_indices = @transform_4, window_bounds = array<i64: 1, 256>}, {pipeline_mode = #tpu.pipeline_mode<synchronous>, transform_indices = @transform_5, window_bounds = array<i64: 256, 128>}, {pipeline_mode = #tpu.pipeline_mode<synchronous>, transform_indices = @transform_6, window_bounds = array<i64: 1, 128>}, {transform_indices = @transform_7, window_bounds = array<i64: 1, 1, 128>}]} {
    %c0_i32 = arith.constant 0 : i32
    %0 = arith.cmpi eq, %arg1, %c0_i32 : i32
    %1 = arith.extui %0 : i1 to i32
    %c0_i32_0 = arith.constant 0 : i32
    %2 = arith.cmpi ne, %1, %c0_i32_0 : i32
    scf.if %2 {
      %cst_21 = arith.constant 0.000000e+00 : f32
      %36 = vector.broadcast %cst_21 : f32 to vector<1x256xf32>
      %c0_22 = arith.constant 0 : index
      %c0_23 = arith.constant 0 : index
      %37 = vector.load %arg10[%c0_22, %c0_23] : memref<1x256xf32, #tpu.memory_space<vmem>>, vector<1x256xf32>
      tpu.vector_store %arg10[%c0_22, %c0_23], %36 {strides = array<i32>} : memref<1x256xf32, #tpu.memory_space<vmem>>, vector<1x256xf32>,
    } else {
    }
    %c0 = arith.constant 0 : index
    %c0_1 = arith.constant 0 : index
    %c0_2 = arith.constant 0 : index
    %3 = vector.load %arg2[%c0, %c0_1, %c0_2] : memref<1x64x128xbf16, #tpu.memory_space<vmem>>, vector<1x64x128xbf16>
    %4 = vector.shape_cast %3 : vector<1x64x128xbf16> to vector<64x128xbf16>
    %c0_3 = arith.constant 0 : index
    %c0_4 = arith.constant 0 : index
    %5 = vector.load %arg3[%c0_3, %c0_4] : memref<128x256xbf16, #tpu.memory_space<vmem>>, vector<128x256xbf16>
    %cst = arith.constant dense<0.000000e+00> : vector<64x256xf32>
    %6 = tpu.matmul %4, %5, %cst {dimension_numbers = #tpu.dot_dimension_numbers<[1], [0], [0], [1], [0, 0, 1, 1], [], []>} : vector<64x128xbf16>, vector<128x256xbf16>, vector<64x256xf32> -> vector<64x256xf32>
    %c0_5 = arith.constant 0 : index
    %c0_6 = arith.constant 0 : index
    %7 = vector.load %arg4[%c0_5, %c0_6] : memref<1x256xf32, #tpu.memory_space<vmem>>, vector<1x256xf32>
    %8 = vector.broadcast %7 : vector<1x256xf32> to vector<64x256xf32>
    %9 = arith.addf %6, %8 : vector<64x256xf32>
    %10 = arith.negf %9 : vector<64x256xf32>
    %11 = math.exp %10 : vector<64x256xf32>
    %cst_7 = arith.constant 1.000000e+00 : f32
    %12 = vector.broadcast %cst_7 : f32 to vector<64x256xf32>
    %13 = arith.addf %12, %11 : vector<64x256xf32>
    %14 = arith.divf %12, %13 : vector<64x256xf32>
    %15 = arith.mulf %9, %14 : vector<64x256xf32>
    %16 = arith.truncf %15 : vector<64x256xf32> to vector<64x256xbf16>
    %c0_8 = arith.constant 0 : index
    %c0_9 = arith.constant 0 : index
    %17 = vector.load %arg5[%c0_8, %c0_9] : memref<256x256xbf16, #tpu.memory_space<vmem>>, vector<256x256xbf16>
    %cst_10 = arith.constant dense<0.000000e+00> : vector<64x256xf32>
    %18 = tpu.matmul %16, %17, %cst_10 {dimension_numbers = #tpu.dot_dimension_numbers<[1], [0], [0], [1], [0, 0, 1, 1], [], []>} : vector<64x256xbf16>, vector<256x256xbf16>, vector<64x256xf32> -> vector<64x256xf32>
    %c0_11 = arith.constant 0 : index
    %c0_12 = arith.constant 0 : index
    %19 = vector.load %arg6[%c0_11, %c0_12] : memref<1x256xf32, #tpu.memory_space<vmem>>, vector<1x256xf32>
    %20 = vector.broadcast %19 : vector<1x256xf32> to vector<64x256xf32>
    %21 = arith.addf %18, %20 : vector<64x256xf32>
    %22 = arith.negf %21 : vector<64x256xf32>
    %23 = math.exp %22 : vector<64x256xf32>
    %cst_13 = arith.constant 1.000000e+00 : f32
    %24 = vector.broadcast %cst_13 : f32 to vector<64x256xf32>
    %25 = arith.addf %24, %23 : vector<64x256xf32>
    %26 = arith.divf %24, %25 : vector<64x256xf32>
    %27 = arith.mulf %21, %26 : vector<64x256xf32>
    %c0_14 = arith.constant 0 : index
    %c0_15 = arith.constant 0 : index
    %28 = vector.load %arg10[%c0_14, %c0_15] : memref<1x256xf32, #tpu.memory_space<vmem>>, vector<1x256xf32>
    %cst_16 = arith.constant dense<0.000000e+00> : vector<256xf32>
    %29 = vector.multi_reduction <add>, %27, %cst_16 [0] : vector<64x256xf32> to vector<256xf32>
    %30 = vector.shape_cast %29 : vector<256xf32> to vector<1x256xf32>
    %31 = arith.addf %28, %30 : vector<1x256xf32>
    %c0_17 = arith.constant 0 : index
    %c0_18 = arith.constant 0 : index
    %32 = vector.load %arg10[%c0_17, %c0_18] : memref<1x256xf32, #tpu.memory_space<vmem>>, vector<1x256xf32>
    tpu.vector_store %arg10[%c0_17, %c0_18], %31 {strides = array<i32>} : memref<1x256xf32, #tpu.memory_space<vmem>>, vector<1x256xf32>,
    %c0_i32_19 = arith.constant 0 : i32
    %33 = arith.cmpi eq, %arg1, %c0_i32_19 : i32
    %34 = arith.extui %33 : i1 to i32
    %c0_i32_20 = arith.constant 0 : i32
    %35 = arith.cmpi ne, %34, %c0_i32_20 : i32
    scf.if %35 {
      %c0_21 = arith.constant 0 : index
      %c0_22 = arith.constant 0 : index
      %36 = vector.load %arg10[%c0_21, %c0_22] : memref<1x256xf32, #tpu.memory_space<vmem>>, vector<1x256xf32>
      %cst_23 = arith.constant 1.562500e-02 : f32
      %37 = vector.broadcast %cst_23 : f32 to vector<1x256xf32>
      %38 = arith.mulf %36, %37 : vector<1x256xf32>
      %39 = arith.truncf %38 : vector<1x256xf32> to vector<1x256xbf16>
      %c0_24 = arith.constant 0 : index
      %c0_25 = arith.constant 0 : index
      %40 = vector.load %arg7[%c0_24, %c0_25] : memref<256x128xbf16, #tpu.memory_space<vmem>>, vector<256x128xbf16>
      %cst_26 = arith.constant dense<0.000000e+00> : vector<1x128xf32>
      %41 = tpu.matmul %39, %40, %cst_26 {dimension_numbers = #tpu.dot_dimension_numbers<[1], [0], [0], [1], [0, 0, 1, 1], [], []>} : vector<1x256xbf16>, vector<256x128xbf16>, vector<1x128xf32> -> vector<1x128xf32>
      %c0_27 = arith.constant 0 : index
      %c0_28 = arith.constant 0 : index
      %42 = vector.load %arg8[%c0_27, %c0_28] : memref<1x128xf32, #tpu.memory_space<vmem>>, vector<1x128xf32>
      %43 = arith.addf %41, %42 : vector<1x128xf32>
      %cst_29 = arith.constant dense<0xFF800000> : vector<1xf32>
      %44 = vector.multi_reduction <maximumf>, %43, %cst_29 [1] : vector<1x128xf32> to vector<1xf32>
      %45 = vector.shape_cast %44 : vector<1xf32> to vector<1x1xf32>
      %46 = vector.broadcast %45 : vector<1x1xf32> to vector<1x128xf32>
      %47 = arith.subf %43, %46 : vector<1x128xf32>
      %48 = math.exp %47 : vector<1x128xf32>
      %cst_30 = arith.constant dense<0.000000e+00> : vector<1xf32>
      %49 = vector.multi_reduction <add>, %48, %cst_30 [1] : vector<1x128xf32> to vector<1xf32>
      %50 = vector.shape_cast %49 : vector<1xf32> to vector<1x1xf32>
      %51 = vector.broadcast %50 : vector<1x1xf32> to vector<1x128xf32>
      %52 = arith.divf %48, %51 : vector<1x128xf32>
      %53 = vector.shape_cast %52 : vector<1x128xf32> to vector<1x1x128xf32>
      %c0_31 = arith.constant 0 : index
      %c0_32 = arith.constant 0 : index
      %c0_33 = arith.constant 0 : index
      %54 = vector.load %arg9[%c0_31, %c0_32, %c0_33] : memref<1x1x128xf32, #tpu.memory_space<vmem>>, vector<1x1x128xf32>
      tpu.vector_store %arg9[%c0_31, %c0_32, %c0_33], %53 {strides = array<i32>} : memref<1x1x128xf32, #tpu.memory_space<vmem>>, vector<1x1x128xf32>,
    } else {
    }
    return
  }
  func.func @transform_0(%arg0: i32, %arg1: i32) -> (i32, i32, i32) {
    %c0_i32 = arith.constant 0 : i32
    %c0_i32_0 = arith.constant 0 : i32
    return %arg0, %arg1, %c0_i32 : i32, i32, i32
  }
  func.func @transform_1(%arg0: i32, %arg1: i32) -> (i32, i32) {
    %c0_i32 = arith.constant 0 : i32
    %c0_i32_0 = arith.constant 0 : i32
    %c0_i32_1 = arith.constant 0 : i32
    return %c0_i32, %c0_i32_0 : i32, i32
  }
  func.func @transform_2(%arg0: i32, %arg1: i32) -> (i32, i32) {
    %c0_i32 = arith.constant 0 : i32
    %c0_i32_0 = arith.constant 0 : i32
    %c0_i32_1 = arith.constant 0 : i32
    return %c0_i32, %c0_i32_0 : i32, i32
  }
  func.func @transform_3(%arg0: i32, %arg1: i32) -> (i32, i32) {
    %c0_i32 = arith.constant 0 : i32
    %c0_i32_0 = arith.constant 0 : i32
    %c0_i32_1 = arith.constant 0 : i32
    return %c0_i32, %c0_i32_0 : i32, i32
  }
  func.func @transform_4(%arg0: i32, %arg1: i32) -> (i32, i32) {
    %c0_i32 = arith.constant 0 : i32
    %c0_i32_0 = arith.constant 0 : i32
    %c0_i32_1 = arith.constant 0 : i32
    return %c0_i32, %c0_i32_0 : i32, i32
  }
  func.func @transform_5(%arg0: i32, %arg1: i32) -> (i32, i32) {
    %c0_i32 = arith.constant 0 : i32
    %c0_i32_0 = arith.constant 0 : i32
    %c0_i32_1 = arith.constant 0 : i32
    return %c0_i32, %c0_i32_0 : i32, i32
  }
  func.func @transform_6(%arg0: i32, %arg1: i32) -> (i32, i32) {
    %c0_i32 = arith.constant 0 : i32
    %c0_i32_0 = arith.constant 0 : i32
    %c0_i32_1 = arith.constant 0 : i32
    return %c0_i32, %c0_i32_0 : i32, i32
  }
  func.func @transform_7(%arg0: i32, %arg1: i32) -> (i32, i32, i32) {
    %c0_i32 = arith.constant 0 : i32
    %c0_i32_0 = arith.constant 0 : i32
    %c0_i32_1 = arith.constant 0 : i32
    return %arg0, %c0_i32, %c0_i32_0 : i32, i32, i32
  }
}

module attributes {stable_mosaic.version = 11 : i64} {
  func.func @_stem_dw_kernel(%arg0: i32, %arg1: memref<1x9x9x3xbf16, #tpu.memory_space<vmem>>, %arg2: memref<1x9x9x3xbf16, #tpu.memory_space<vmem>>, %arg3: memref<1x9x9x3xbf16, #tpu.memory_space<vmem>>, %arg4: memref<1x9x9x3xbf16, #tpu.memory_space<vmem>>, %arg5: memref<27x128xbf16, #tpu.memory_space<vmem>>, %arg6: memref<1x128xf32, #tpu.memory_space<vmem>>, %arg7: memref<9x128xf32, #tpu.memory_space<vmem>>, %arg8: memref<1x128xf32, #tpu.memory_space<vmem>>, %arg9: memref<1x8x8x128xbf16, #tpu.memory_space<vmem>>, %arg10: memref<10x10x128xf32, #tpu.memory_space<vmem>>) attributes {dimension_semantics = [#tpu.dimension_semantics<parallel>], iteration_bounds = array<i64: 2>, scalar_prefetch = 0 : i64, scratch_operands = 1 : i64, tpu.core_type = #tpu.core_type<tc>, window_params = [{transform_indices = @transform_0, window_bounds = array<i64: 1, 9, 9, 3>}, {transform_indices = @transform_1, window_bounds = array<i64: 1, 9, 9, 3>}, {transform_indices = @transform_2, window_bounds = array<i64: 1, 9, 9, 3>}, {transform_indices = @transform_3, window_bounds = array<i64: 1, 9, 9, 3>}, {pipeline_mode = #tpu.pipeline_mode<synchronous>, transform_indices = @transform_4, window_bounds = array<i64: 27, 128>}, {pipeline_mode = #tpu.pipeline_mode<synchronous>, transform_indices = @transform_5, window_bounds = array<i64: 1, 128>}, {pipeline_mode = #tpu.pipeline_mode<synchronous>, transform_indices = @transform_6, window_bounds = array<i64: 9, 128>}, {pipeline_mode = #tpu.pipeline_mode<synchronous>, transform_indices = @transform_7, window_bounds = array<i64: 1, 128>}, {transform_indices = @transform_8, window_bounds = array<i64: 1, 8, 8, 128>}]} {
    %c0 = arith.constant 0 : index
    %c0_0 = arith.constant 0 : index
    %c0_1 = arith.constant 0 : index
    %c0_2 = arith.constant 0 : index
    %0 = vector.load %arg1[%c0, %c0_0, %c0_1, %c0_2] : memref<1x9x9x3xbf16, #tpu.memory_space<vmem>>, vector<1x9x9x3xbf16>
    %1 = vector.shape_cast %0 : vector<1x9x9x3xbf16> to vector<9x9x3xbf16>
    %c0_3 = arith.constant 0 : index
    %c0_4 = arith.constant 0 : index
    %c0_5 = arith.constant 0 : index
    %c0_6 = arith.constant 0 : index
    %2 = vector.load %arg2[%c0_3, %c0_4, %c0_5, %c0_6] : memref<1x9x9x3xbf16, #tpu.memory_space<vmem>>, vector<1x9x9x3xbf16>
    %3 = vector.shape_cast %2 : vector<1x9x9x3xbf16> to vector<9x9x3xbf16>
    %c0_7 = arith.constant 0 : index
    %c0_8 = arith.constant 0 : index
    %c0_9 = arith.constant 0 : index
    %c0_10 = arith.constant 0 : index
    %4 = vector.load %arg3[%c0_7, %c0_8, %c0_9, %c0_10] : memref<1x9x9x3xbf16, #tpu.memory_space<vmem>>, vector<1x9x9x3xbf16>
    %5 = vector.shape_cast %4 : vector<1x9x9x3xbf16> to vector<9x9x3xbf16>
    %c0_11 = arith.constant 0 : index
    %c0_12 = arith.constant 0 : index
    %c0_13 = arith.constant 0 : index
    %c0_14 = arith.constant 0 : index
    %6 = vector.load %arg4[%c0_11, %c0_12, %c0_13, %c0_14] : memref<1x9x9x3xbf16, #tpu.memory_space<vmem>>, vector<1x9x9x3xbf16>
    %7 = vector.shape_cast %6 : vector<1x9x9x3xbf16> to vector<9x9x3xbf16>
    %8 = vector.extract_strided_slice %1 {offsets = [0, 0, 0], sizes = [8, 8, 3], strides = [1, 1, 1]} : vector<9x9x3xbf16> to vector<8x8x3xbf16>
    %9 = vector.shape_cast %8 : vector<8x8x3xbf16> to vector<64x3xbf16>
    %10 = vector.extract_strided_slice %3 {offsets = [0, 0, 0], sizes = [8, 8, 3], strides = [1, 1, 1]} : vector<9x9x3xbf16> to vector<8x8x3xbf16>
    %11 = vector.shape_cast %10 : vector<8x8x3xbf16> to vector<64x3xbf16>
    %12 = vector.extract_strided_slice %1 {offsets = [0, 1, 0], sizes = [8, 8, 3], strides = [1, 1, 1]} : vector<9x9x3xbf16> to vector<8x8x3xbf16>
    %13 = vector.shape_cast %12 : vector<8x8x3xbf16> to vector<64x3xbf16>
    %14 = vector.extract_strided_slice %5 {offsets = [0, 0, 0], sizes = [8, 8, 3], strides = [1, 1, 1]} : vector<9x9x3xbf16> to vector<8x8x3xbf16>
    %15 = vector.shape_cast %14 : vector<8x8x3xbf16> to vector<64x3xbf16>
    %16 = vector.extract_strided_slice %7 {offsets = [0, 0, 0], sizes = [8, 8, 3], strides = [1, 1, 1]} : vector<9x9x3xbf16> to vector<8x8x3xbf16>
    %17 = vector.shape_cast %16 : vector<8x8x3xbf16> to vector<64x3xbf16>
    %18 = vector.extract_strided_slice %5 {offsets = [0, 1, 0], sizes = [8, 8, 3], strides = [1, 1, 1]} : vector<9x9x3xbf16> to vector<8x8x3xbf16>
    %19 = vector.shape_cast %18 : vector<8x8x3xbf16> to vector<64x3xbf16>
    %20 = vector.extract_strided_slice %1 {offsets = [1, 0, 0], sizes = [8, 8, 3], strides = [1, 1, 1]} : vector<9x9x3xbf16> to vector<8x8x3xbf16>
    %21 = vector.shape_cast %20 : vector<8x8x3xbf16> to vector<64x3xbf16>
    %22 = vector.extract_strided_slice %3 {offsets = [1, 0, 0], sizes = [8, 8, 3], strides = [1, 1, 1]} : vector<9x9x3xbf16> to vector<8x8x3xbf16>
    %23 = vector.shape_cast %22 : vector<8x8x3xbf16> to vector<64x3xbf16>
    %24 = vector.extract_strided_slice %1 {offsets = [1, 1, 0], sizes = [8, 8, 3], strides = [1, 1, 1]} : vector<9x9x3xbf16> to vector<8x8x3xbf16>
    %25 = vector.shape_cast %24 : vector<8x8x3xbf16> to vector<64x3xbf16>
    %26 = tpu.concatenate %9, %11, %13, %15, %17, %19, %21, %23, %25 in 1 : vector<64x3xbf16>, vector<64x3xbf16>, vector<64x3xbf16>, vector<64x3xbf16>, vector<64x3xbf16>, vector<64x3xbf16>, vector<64x3xbf16>, vector<64x3xbf16>, vector<64x3xbf16> -> vector<64x27xbf16>
    %c0_15 = arith.constant 0 : index
    %c0_16 = arith.constant 0 : index
    %27 = vector.load %arg5[%c0_15, %c0_16] : memref<27x128xbf16, #tpu.memory_space<vmem>>, vector<27x128xbf16>
    %cst = arith.constant dense<0.000000e+00> : vector<64x128xf32>
    %28 = tpu.matmul %26, %27, %cst {dimension_numbers = #tpu.dot_dimension_numbers<[1], [0], [0], [1], [0, 0, 1, 1], [], []>} : vector<64x27xbf16>, vector<27x128xbf16>, vector<64x128xf32> -> vector<64x128xf32>
    %c0_17 = arith.constant 0 : index
    %c0_18 = arith.constant 0 : index
    %29 = vector.load %arg6[%c0_17, %c0_18] : memref<1x128xf32, #tpu.memory_space<vmem>>, vector<1x128xf32>
    %30 = vector.broadcast %29 : vector<1x128xf32> to vector<64x128xf32>
    %31 = arith.addf %28, %30 : vector<64x128xf32>
    %32 = arith.negf %31 : vector<64x128xf32>
    %33 = math.exp %32 : vector<64x128xf32>
    %cst_19 = arith.constant 1.000000e+00 : f32
    %34 = vector.broadcast %cst_19 : f32 to vector<64x128xf32>
    %35 = arith.addf %34, %33 : vector<64x128xf32>
    %36 = arith.divf %34, %35 : vector<64x128xf32>
    %37 = arith.mulf %31, %36 : vector<64x128xf32>
    %cst_20 = arith.constant 0.000000e+00 : f32
    %38 = vector.broadcast %cst_20 : f32 to vector<10x10x128xf32>
    %c0_21 = arith.constant 0 : index
    %c0_22 = arith.constant 0 : index
    %c0_23 = arith.constant 0 : index
    %39 = vector.load %arg10[%c0_21, %c0_22, %c0_23] : memref<10x10x128xf32, #tpu.memory_space<vmem>>, vector<10x10x128xf32>
    tpu.vector_store %arg10[%c0_21, %c0_22, %c0_23], %38 {strides = array<i32>} : memref<10x10x128xf32, #tpu.memory_space<vmem>>, vector<10x10x128xf32>,
    %40 = vector.shape_cast %37 : vector<64x128xf32> to vector<8x8x128xf32>
    %c1 = arith.constant 1 : index
    %c1_24 = arith.constant 1 : index
    %c0_25 = arith.constant 0 : index
    %41 = vector.load %arg10[%c1, %c1_24, %c0_25] : memref<10x10x128xf32, #tpu.memory_space<vmem>>, vector<8x8x128xf32>
    tpu.vector_store %arg10[%c1, %c1_24, %c0_25], %40 {strides = array<i32>} : memref<10x10x128xf32, #tpu.memory_space<vmem>>, vector<8x8x128xf32>,
    %c0_26 = arith.constant 0 : index
    %c0_27 = arith.constant 0 : index
    %c0_28 = arith.constant 0 : index
    %42 = vector.load %arg10[%c0_26, %c0_27, %c0_28] : memref<10x10x128xf32, #tpu.memory_space<vmem>>, vector<10x10x128xf32>
    %c0_29 = arith.constant 0 : index
    %c0_30 = arith.constant 0 : index
    %43 = vector.load %arg7[%c0_29, %c0_30] : memref<9x128xf32, #tpu.memory_space<vmem>>, vector<9x128xf32>
    %cst_31 = arith.constant 0.000000e+00 : f32
    %44 = vector.broadcast %cst_31 : f32 to vector<8x8x128xf32>
    %45 = vector.extract_strided_slice %42 {offsets = [0, 0, 0], sizes = [8, 8, 128], strides = [1, 1, 1]} : vector<10x10x128xf32> to vector<8x8x128xf32>
    %46 = vector.extract_strided_slice %43 {offsets = [0, 0], sizes = [1, 128], strides = [1, 1]} : vector<9x128xf32> to vector<1x128xf32>
    %47 = vector.shape_cast %46 : vector<1x128xf32> to vector<128xf32>
    %48 = vector.shape_cast %47 : vector<128xf32> to vector<1x1x128xf32>
    %49 = vector.broadcast %48 : vector<1x1x128xf32> to vector<8x8x128xf32>
    %50 = arith.mulf %45, %49 : vector<8x8x128xf32>
    %51 = arith.addf %44, %50 : vector<8x8x128xf32>
    %52 = vector.extract_strided_slice %42 {offsets = [0, 1, 0], sizes = [8, 8, 128], strides = [1, 1, 1]} : vector<10x10x128xf32> to vector<8x8x128xf32>
    %53 = vector.extract_strided_slice %43 {offsets = [1, 0], sizes = [1, 128], strides = [1, 1]} : vector<9x128xf32> to vector<1x128xf32>
    %54 = vector.shape_cast %53 : vector<1x128xf32> to vector<128xf32>
    %55 = vector.shape_cast %54 : vector<128xf32> to vector<1x1x128xf32>
    %56 = vector.broadcast %55 : vector<1x1x128xf32> to vector<8x8x128xf32>
    %57 = arith.mulf %52, %56 : vector<8x8x128xf32>
    %58 = arith.addf %51, %57 : vector<8x8x128xf32>
    %59 = vector.extract_strided_slice %42 {offsets = [0, 2, 0], sizes = [8, 8, 128], strides = [1, 1, 1]} : vector<10x10x128xf32> to vector<8x8x128xf32>
    %60 = vector.extract_strided_slice %43 {offsets = [2, 0], sizes = [1, 128], strides = [1, 1]} : vector<9x128xf32> to vector<1x128xf32>
    %61 = vector.shape_cast %60 : vector<1x128xf32> to vector<128xf32>
    %62 = vector.shape_cast %61 : vector<128xf32> to vector<1x1x128xf32>
    %63 = vector.broadcast %62 : vector<1x1x128xf32> to vector<8x8x128xf32>
    %64 = arith.mulf %59, %63 : vector<8x8x128xf32>
    %65 = arith.addf %58, %64 : vector<8x8x128xf32>
    %66 = vector.extract_strided_slice %42 {offsets = [1, 0, 0], sizes = [8, 8, 128], strides = [1, 1, 1]} : vector<10x10x128xf32> to vector<8x8x128xf32>
    %67 = vector.extract_strided_slice %43 {offsets = [3, 0], sizes = [1, 128], strides = [1, 1]} : vector<9x128xf32> to vector<1x128xf32>
    %68 = vector.shape_cast %67 : vector<1x128xf32> to vector<128xf32>
    %69 = vector.shape_cast %68 : vector<128xf32> to vector<1x1x128xf32>
    %70 = vector.broadcast %69 : vector<1x1x128xf32> to vector<8x8x128xf32>
    %71 = arith.mulf %66, %70 : vector<8x8x128xf32>
    %72 = arith.addf %65, %71 : vector<8x8x128xf32>
    %73 = vector.extract_strided_slice %42 {offsets = [1, 1, 0], sizes = [8, 8, 128], strides = [1, 1, 1]} : vector<10x10x128xf32> to vector<8x8x128xf32>
    %74 = vector.extract_strided_slice %43 {offsets = [4, 0], sizes = [1, 128], strides = [1, 1]} : vector<9x128xf32> to vector<1x128xf32>
    %75 = vector.shape_cast %74 : vector<1x128xf32> to vector<128xf32>
    %76 = vector.shape_cast %75 : vector<128xf32> to vector<1x1x128xf32>
    %77 = vector.broadcast %76 : vector<1x1x128xf32> to vector<8x8x128xf32>
    %78 = arith.mulf %73, %77 : vector<8x8x128xf32>
    %79 = arith.addf %72, %78 : vector<8x8x128xf32>
    %80 = vector.extract_strided_slice %42 {offsets = [1, 2, 0], sizes = [8, 8, 128], strides = [1, 1, 1]} : vector<10x10x128xf32> to vector<8x8x128xf32>
    %81 = vector.extract_strided_slice %43 {offsets = [5, 0], sizes = [1, 128], strides = [1, 1]} : vector<9x128xf32> to vector<1x128xf32>
    %82 = vector.shape_cast %81 : vector<1x128xf32> to vector<128xf32>
    %83 = vector.shape_cast %82 : vector<128xf32> to vector<1x1x128xf32>
    %84 = vector.broadcast %83 : vector<1x1x128xf32> to vector<8x8x128xf32>
    %85 = arith.mulf %80, %84 : vector<8x8x128xf32>
    %86 = arith.addf %79, %85 : vector<8x8x128xf32>
    %87 = vector.extract_strided_slice %42 {offsets = [2, 0, 0], sizes = [8, 8, 128], strides = [1, 1, 1]} : vector<10x10x128xf32> to vector<8x8x128xf32>
    %88 = vector.extract_strided_slice %43 {offsets = [6, 0], sizes = [1, 128], strides = [1, 1]} : vector<9x128xf32> to vector<1x128xf32>
    %89 = vector.shape_cast %88 : vector<1x128xf32> to vector<128xf32>
    %90 = vector.shape_cast %89 : vector<128xf32> to vector<1x1x128xf32>
    %91 = vector.broadcast %90 : vector<1x1x128xf32> to vector<8x8x128xf32>
    %92 = arith.mulf %87, %91 : vector<8x8x128xf32>
    %93 = arith.addf %86, %92 : vector<8x8x128xf32>
    %94 = vector.extract_strided_slice %42 {offsets = [2, 1, 0], sizes = [8, 8, 128], strides = [1, 1, 1]} : vector<10x10x128xf32> to vector<8x8x128xf32>
    %95 = vector.extract_strided_slice %43 {offsets = [7, 0], sizes = [1, 128], strides = [1, 1]} : vector<9x128xf32> to vector<1x128xf32>
    %96 = vector.shape_cast %95 : vector<1x128xf32> to vector<128xf32>
    %97 = vector.shape_cast %96 : vector<128xf32> to vector<1x1x128xf32>
    %98 = vector.broadcast %97 : vector<1x1x128xf32> to vector<8x8x128xf32>
    %99 = arith.mulf %94, %98 : vector<8x8x128xf32>
    %100 = arith.addf %93, %99 : vector<8x8x128xf32>
    %101 = vector.extract_strided_slice %42 {offsets = [2, 2, 0], sizes = [8, 8, 128], strides = [1, 1, 1]} : vector<10x10x128xf32> to vector<8x8x128xf32>
    %102 = vector.extract_strided_slice %43 {offsets = [8, 0], sizes = [1, 128], strides = [1, 1]} : vector<9x128xf32> to vector<1x128xf32>
    %103 = vector.shape_cast %102 : vector<1x128xf32> to vector<128xf32>
    %104 = vector.shape_cast %103 : vector<128xf32> to vector<1x1x128xf32>
    %105 = vector.broadcast %104 : vector<1x1x128xf32> to vector<8x8x128xf32>
    %106 = arith.mulf %101, %105 : vector<8x8x128xf32>
    %107 = arith.addf %100, %106 : vector<8x8x128xf32>
    %c0_32 = arith.constant 0 : index
    %c0_33 = arith.constant 0 : index
    %108 = vector.load %arg8[%c0_32, %c0_33] : memref<1x128xf32, #tpu.memory_space<vmem>>, vector<1x128xf32>
    %109 = vector.shape_cast %108 : vector<1x128xf32> to vector<128xf32>
    %110 = vector.shape_cast %109 : vector<128xf32> to vector<1x1x128xf32>
    %111 = vector.broadcast %110 : vector<1x1x128xf32> to vector<8x8x128xf32>
    %112 = arith.addf %107, %111 : vector<8x8x128xf32>
    %113 = arith.negf %112 : vector<8x8x128xf32>
    %114 = math.exp %113 : vector<8x8x128xf32>
    %cst_34 = arith.constant 1.000000e+00 : f32
    %115 = vector.broadcast %cst_34 : f32 to vector<8x8x128xf32>
    %116 = arith.addf %115, %114 : vector<8x8x128xf32>
    %117 = arith.divf %115, %116 : vector<8x8x128xf32>
    %118 = arith.mulf %112, %117 : vector<8x8x128xf32>
    %119 = vector.shape_cast %118 : vector<8x8x128xf32> to vector<1x8x8x128xf32>
    %120 = arith.truncf %119 : vector<1x8x8x128xf32> to vector<1x8x8x128xbf16>
    %c0_35 = arith.constant 0 : index
    %c0_36 = arith.constant 0 : index
    %c0_37 = arith.constant 0 : index
    %c0_38 = arith.constant 0 : index
    %121 = vector.load %arg9[%c0_35, %c0_36, %c0_37, %c0_38] : memref<1x8x8x128xbf16, #tpu.memory_space<vmem>>, vector<1x8x8x128xbf16>
    tpu.vector_store %arg9[%c0_35, %c0_36, %c0_37, %c0_38], %120 {strides = array<i32>} : memref<1x8x8x128xbf16, #tpu.memory_space<vmem>>, vector<1x8x8x128xbf16>,
    return
  }
  func.func @transform_0(%arg0: i32) -> (i32, i32, i32, i32) {
    %c0_i32 = arith.constant 0 : i32
    %c0_i32_0 = arith.constant 0 : i32
    %c0_i32_1 = arith.constant 0 : i32
    %c0_i32_2 = arith.constant 0 : i32
    return %arg0, %c0_i32, %c0_i32_0, %c0_i32_1 : i32, i32, i32, i32
  }
  func.func @transform_1(%arg0: i32) -> (i32, i32, i32, i32) {
    %c0_i32 = arith.constant 0 : i32
    %c0_i32_0 = arith.constant 0 : i32
    %c0_i32_1 = arith.constant 0 : i32
    %c0_i32_2 = arith.constant 0 : i32
    return %arg0, %c0_i32, %c0_i32_0, %c0_i32_1 : i32, i32, i32, i32
  }
  func.func @transform_2(%arg0: i32) -> (i32, i32, i32, i32) {
    %c0_i32 = arith.constant 0 : i32
    %c0_i32_0 = arith.constant 0 : i32
    %c0_i32_1 = arith.constant 0 : i32
    %c0_i32_2 = arith.constant 0 : i32
    return %arg0, %c0_i32, %c0_i32_0, %c0_i32_1 : i32, i32, i32, i32
  }
  func.func @transform_3(%arg0: i32) -> (i32, i32, i32, i32) {
    %c0_i32 = arith.constant 0 : i32
    %c0_i32_0 = arith.constant 0 : i32
    %c0_i32_1 = arith.constant 0 : i32
    %c0_i32_2 = arith.constant 0 : i32
    return %arg0, %c0_i32, %c0_i32_0, %c0_i32_1 : i32, i32, i32, i32
  }
  func.func @transform_4(%arg0: i32) -> (i32, i32) {
    %c0_i32 = arith.constant 0 : i32
    %c0_i32_0 = arith.constant 0 : i32
    %c0_i32_1 = arith.constant 0 : i32
    return %c0_i32, %c0_i32_0 : i32, i32
  }
  func.func @transform_5(%arg0: i32) -> (i32, i32) {
    %c0_i32 = arith.constant 0 : i32
    %c0_i32_0 = arith.constant 0 : i32
    %c0_i32_1 = arith.constant 0 : i32
    return %c0_i32, %c0_i32_0 : i32, i32
  }
  func.func @transform_6(%arg0: i32) -> (i32, i32) {
    %c0_i32 = arith.constant 0 : i32
    %c0_i32_0 = arith.constant 0 : i32
    %c0_i32_1 = arith.constant 0 : i32
    return %c0_i32, %c0_i32_0 : i32, i32
  }
  func.func @transform_7(%arg0: i32) -> (i32, i32) {
    %c0_i32 = arith.constant 0 : i32
    %c0_i32_0 = arith.constant 0 : i32
    %c0_i32_1 = arith.constant 0 : i32
    return %c0_i32, %c0_i32_0 : i32, i32
  }
  func.func @transform_8(%arg0: i32) -> (i32, i32, i32, i32) {
    %c0_i32 = arith.constant 0 : i32
    %c0_i32_0 = arith.constant 0 : i32
    %c0_i32_1 = arith.constant 0 : i32
    %c0_i32_2 = arith.constant 0 : i32
    return %arg0, %c0_i32, %c0_i32_0, %c0_i32_1 : i32, i32, i32, i32
  }
}

</mosaic_0001>

<bundles_post_ra>
// kernel: efficientnet_forward.3
= control target key start
LH: loop header
LB: loop body
LE: loop exit
PB: predicated region body
PF: predicated region fallthrough
CT: control target
= control target key end

     0   :  { %12 = vsyncpa [#allocation4], 0  ;;  %s2424_s0 = inlined_call_operand.vmem [shape: bf16[2,64,128], index: 0, kind: input, shape index: {}]   ;;  %s2425_s1 = inlined_call_operand.vmem [shape: bf16[128,256], index: 1, kind: input, shape index: {}]   ;;  %s2426_s2 = inlined_call_operand.vmem [shape: f32[1,256], index: 2, kind: input, shape index: {}]   ;;  %s2427_s3 = inlined_call_operand.vmem [shape: bf16[256,256], index: 3, kind: input, shape index: {}]   ;;  %s2428_s4 = inlined_call_operand.vmem [shape: f32[1,256], index: 4, kind: input, shape index: {}]   ;;  %s2429_s5 = inlined_call_operand.vmem [shape: bf16[256,128], index: 5, kind: input, shape index: {}]   ;;  %s2430_s6 = inlined_call_operand.vmem [shape: f32[1,128], index: 6, kind: input, shape index: {}]   ;;  %s2431_s7 = inlined_call_operand.hbm [shape: f32[2,1,128], index: 7, kind: output, shape index: {}]  }
   0x1   :  { %14 = vsyncpa [#allocation4 + $0x1], 0  ;;  %s1908_s24 = smov 0   ;;  %s1910_s25 = smov 0  }
   0x2   :  { %s1912_s26 = smov 0   ;;  %s1914_s27 = smov 0  }
   0x3   :  { %s1916_s28 = smov 0   ;;  %s1918_s29 = smov 0  }
   0x4 LB: > { %s1369_s30 = sadd.s32 4294967295, %s1862_s29   ;;  %s1370_s8 = sadd.s32 4294967294, %s1862_s29   ;;  %s1862_s29 = sphi %s1918_s29, %s20_s29   ;;  %s1858_s28 = sphi %s1916_s28, %s2440_s28   ;;  %s1854_s27 = sphi %s1914_s27, %s2439_s27   ;;  %s1850_s26 = sphi %s1912_s26, %s2438_s26   ;;  %s1846_s25 = sphi %s1910_s25, %s2437_s25   ;;  %s1842_s24 = sphi %s1908_s24, %s2436_s24  }
   0x5   : > { %s32_s9 = sadd.s32 1, %s1858_s28  ;;  %s193_s10 = sadd.s32 1, %s1850_s26 }
   0x6   : > { %p34_p0 = scmp.ge.s32.totalorder %s32_s9, 2  ;;  %p203_p1 = scmp.ne.s32.totalorder %s1850_s26, %s1846_s25 }
   0x7   : > { %p204_p2 = scmp.eq.s32.totalorder %s1369_s30, 1  ;;  %p209_p3 = scmp.ne.s32.totalorder %s1846_s25, %s1842_s24 }
   0x8   : > { %s2442_s9 = smov (%p34_p0, %s32_s9), 0  ;;  %p210_p5 = scmp.eq.s32.totalorder %s1370_s8, 1 }
   0x9   : > { %p1948_p4 = por %p204_p2, %p203_p1  ;;  %s190_s12 = ssub.s32 %s1858_s28, %s2442_s9 }
   0xa   : > { %p1373_p6 = scmp.ge.s32.totalorder %s1862_s29, 1  ;;  %p191_p7 = scmp.eq.s32.totalorder %s190_s12, 0 }
   0xb   : > { %p1955_p8 = por %p210_p5, %p209_p3  ;;  %p259_p9 = scmp.lt.s32.totalorder %s1862_s29, 3 }
   0xc   : > { %s1961_s14 = scalar_select %p191_p7, %s1850_s26, %s193_s10  }
   0xd   : > { %p260_p10 = pnand %p1373_p6, %p259_p9 }
   0xe   : > { %v1560_v0 = vld [vmem:[%s2425_s1 + $0x4] ss:$8 sps:$4 sm:$0xff] (!%p260_p10)   ;;  %p295_p11 = scmp.lt.s32.totalorder (!%p260_p10), %s1854_s27, 1  ;;  %v1562_v1 = vld [vmem:[%s2425_s1] ss:$8 sps:$4 sm:$0xff] (!%p260_p10)   ;;  %v1864_v2 = vmov (!%p260_p10), 0   ;;  %v309_v53 = vlaneseq (!%p260_p10) }
   0xf   : > { %263 = sbr.rel (%p260_p10) target bundleno = 1147 (0x47b), region = 48  ;;  %486 = vmatprep.mubr.bf16.mxu0 (!%p260_p10), %v1864_v2  ;;  %454 = vmatprep.subr.bf16.mxu0 (!%p260_p10), %v1560_v0  ;;  %v1563_v3 = vld [vmem:[%s2425_s1 + $0x14] ss:$8 sps:$4 sm:$0xff] (!%p260_p10)   ;;  %v1565_v4 = vld [vmem:[%s2425_s1 + $0x10] ss:$8 sps:$4 sm:$0xff] (!%p260_p10)   ;;  %vm1274_vm1 = vcmask (!%p260_p10), 1040384  }
  0x10   : > { %455 = vmatpush1.bf16.msra.mxu0 (!%p260_p10), %v1562_v1  ;;  %v1566_v5 = vld [vmem:[%s2425_s1 + $0x24] ss:$8 sps:$4 sm:$0xff] (!%p260_p10)   ;;  %v1568_v6 = vld [vmem:[%s2425_s1 + $0x20] ss:$8 sps:$4 sm:$0xff] (!%p260_p10)   ;;  %v1569_v7 = vld [vmem:[%s2425_s1 + $0x34] ss:$8 sps:$4 sm:$0xff] (!%p260_p10)  }
  0x11   : > { %456 = vmatprep.subr.bf16.mxu0 (!%p260_p10), %v1563_v3  ;;  %v1571_v8 = vld [vmem:[%s2425_s1 + $0x30] ss:$8 sps:$4 sm:$0xff] (!%p260_p10)   ;;  %v1572_v9 = vld [vmem:[%s2425_s1 + $0x44] ss:$8 sps:$4 sm:$0xff] (!%p260_p10)   ;;  %v1574_v10 = vld [vmem:[%s2425_s1 + $0x40] ss:$8 sps:$4 sm:$0xff] (!%p260_p10)  }
  0x12   : > { %v1575_v11 = vld [vmem:[%s2425_s1 + $0x54] ss:$8 sps:$4 sm:$0xff] (!%p260_p10)   ;;  %v1588_v12 = vld [vmem:[%s2427_s3 + $0x4] ss:$8 sps:$4 sm:$0xff] (!%p260_p10)   ;;  %v1590_v13 = vld [vmem:[%s2427_s3] ss:$8 sps:$4 sm:$0xff] (!%p260_p10)  }
  0x13   : > { %v1591_v14 = vld [vmem:[%s2427_s3 + $0x14] ss:$8 sps:$4 sm:$0xff] (!%p260_p10)   ;;  %851 = vmatprep.subr.bf16.mxu1 (!%p260_p10), %v1588_v12  ;;  %v1593_v15 = vld [vmem:[%s2427_s3 + $0x10] ss:$8 sps:$4 sm:$0xff] (!%p260_p10)   ;;  %v1594_v17 = vld [vmem:[%s2427_s3 + $0x24] ss:$8 sps:$4 sm:$0xff] (!%p260_p10)  }
  0x14   : > { %457 = vmatpush1.bf16.msra.mxu0 (!%p260_p10), %v1565_v4  ;;  %852 = vmatpush1.bf16.msra.mxu1 (!%p260_p10), %v1590_v13  ;;  %v1577_v16 = vld [vmem:[%s2425_s1 + $0x50] ss:$8 sps:$4 sm:$0xff] (!%p260_p10)   ;;  %v1578_v18 = vld [vmem:[%s2425_s1 + $0x64] ss:$8 sps:$4 sm:$0xff] (!%p260_p10)   ;;  %v1580_v19 = vld [vmem:[%s2425_s1 + $0x60] ss:$8 sps:$4 sm:$0xff] (!%p260_p10)  }
  0x15   : > { %458 = vmatprep.subr.bf16.mxu0 (!%p260_p10), %v1566_v5  ;;  %853 = vmatprep.subr.bf16.mxu1 (!%p260_p10), %v1591_v14  ;;  %v1596_v20 = vld [vmem:[%s2427_s3 + $0x20] ss:$8 sps:$4 sm:$0xff] (!%p260_p10)   ;;  %v1581_v21 = vld [vmem:[%s2425_s1 + $0x74] ss:$8 sps:$4 sm:$0xff] (!%p260_p10)   ;;  %v1599_v23 = vld [vmem:[%s2427_s3 + $0x30] ss:$8 sps:$4 sm:$0xff] (!%p260_p10)  }
  0x16   : > { %s296_s21 = scalar_select %p295_p11, %s1854_s27, 1  ;;  %v1597_v22 = vld [vmem:[%s2427_s3 + $0x34] ss:$8 sps:$4 sm:$0xff]   ;;  %v1583_v24 = vld [vmem:[%s2425_s1 + $0x70] ss:$8 sps:$4 sm:$0xff]   ;;  %v2123_v54 = vshrl.u32 %v309_v53, 7 }
  0x17   : > { %v1600_v25 = vld [vmem:[%s2427_s3 + $0x44] ss:$8 sps:$4 sm:$0xff]   ;;  %v1602_v27 = vld [vmem:[%s2427_s3 + $0x40] ss:$8 sps:$4 sm:$0xff]   ;;  %v1603_v28 = vld [vmem:[%s2427_s3 + $0x54] ss:$8 sps:$4 sm:$0xff]  }
  0x18   : > { %s1479_s10 = sshll.u32 %s296_s21, 5  ;;  %459 = vmatpush1.bf16.msra.mxu0 %v1568_v6  ;;  %854 = vmatpush1.bf16.msra.mxu1 %v1593_v15  ;;  %v1605_v29 = vld [vmem:[%s2427_s3 + $0x50] ss:$8 sps:$4 sm:$0xff]   ;;  %v1606_v30 = vld [vmem:[%s2427_s3 + $0x64] ss:$8 sps:$4 sm:$0xff]   ;;  %v2126_v55 = vsub.s32 0, %v2123_v54 }
  0x19   : > { %s1990_s20 = scalar_lea.vmem %s2424_s0, %s1479_s10  ;;  %460 = vmatprep.subr.bf16.mxu0 %v1569_v7  ;;  %855 = vmatprep.subr.bf16.mxu1 %v1594_v17  ;;  %v1608_v32 = vld [vmem:[%s2427_s3 + $0x60] ss:$8 sps:$4 sm:$0xff]   ;;  %v1609_v35 = vld [vmem:[%s2427_s3 + $0x74] ss:$8 sps:$4 sm:$0xff]   ;;  %v1611_v36 = vld [vmem:[%s2427_s3 + $0x70] ss:$8 sps:$4 sm:$0xff]  }
  0x1a   : > { %v1584_v26 = vld [vmem:[%s1990_s20] sm:$0xff]   ;;  %v1585_v31 = vld [vmem:[%s1990_s20 + $0x8] sm:$0xff]   ;;  %v1586_v33 = vld [vmem:[%s1990_s20 + $0x10] sm:$0xff]   ;;  %v2132_v57 = vsub.s32 1, %v2123_v54  ;;  %vm2233_vm0 = vcmp.lt.s32.totalorder %v309_v53, 256  ;;  %s292_s15 = sand.u32 1, %s1846_s25  }
  0x1b   : > { %v1587_v34 = vld [vmem:[%s1990_s20 + $0x18] sm:$0xff]   ;;  %v1612_v37 = vld [vmem:[%s2427_s3 + $0x84] ss:$8 sps:$4 sm:$0xff]   ;;  %v1614_v38 = vld [vmem:[%s2427_s3 + $0x80] ss:$8 sps:$4 sm:$0xff]   ;;  %s1476_s16 = sshll.u32 %s1854_s27, 4 }
  0x1c   : > { %461 = vmatpush1.bf16.msra.mxu0 %v1571_v8  ;;  %856 = vmatpush1.bf16.msra.mxu1 %v1596_v20  ;;  %v1615_v39 = vld [vmem:[%s2427_s3 + $0x94] ss:$8 sps:$4 sm:$0xff]   ;;  %v1617_v40 = vld [vmem:[%s2427_s3 + $0x90] ss:$8 sps:$4 sm:$0xff]   ;;  %v1618_v41 = vld [vmem:[%s2427_s3 + $0xa4] ss:$8 sps:$4 sm:$0xff]   ;;  %s2377_s22 = scalar_lea.hbm %s2431_s7, %s1476_s16 }
  0x1d   : > { %462 = vmatprep.subr.bf16.mxu0 %v1572_v9  ;;  %857 = vmatprep.subr.bf16.mxu1 %v1597_v22  ;;  %v1620_v42 = vld [vmem:[%s2427_s3 + $0xa0] ss:$8 sps:$4 sm:$0xff]   ;;  %v1621_v43 = vld [vmem:[%s2427_s3 + $0xb4] ss:$8 sps:$4 sm:$0xff]   ;;  %v1623_v44 = vld [vmem:[%s2427_s3 + $0xb0] ss:$8 sps:$4 sm:$0xff]  }
  0x1e   : > { %v1624_v45 = vld [vmem:[%s2427_s3 + $0xc4] ss:$8 sps:$4 sm:$0xff]   ;;  %v1626_v46 = vld [vmem:[%s2427_s3 + $0xc0] ss:$8 sps:$4 sm:$0xff]   ;;  %v1627_v47 = vld [vmem:[%s2427_s3 + $0xd4] ss:$8 sps:$4 sm:$0xff]  }
  0x1f   : > { %v1629_v48 = vld [vmem:[%s2427_s3 + $0xd0] ss:$8 sps:$4 sm:$0xff]   ;;  %v1630_v49 = vld [vmem:[%s2427_s3 + $0xe4] ss:$8 sps:$4 sm:$0xff]   ;;  %v1632_v50 = vld [vmem:[%s2427_s3 + $0xe0] ss:$8 sps:$4 sm:$0xff]  }
  0x20   : > { %463 = vmatpush1.bf16.msra.mxu0 %v1574_v10  ;;  %858 = vmatpush1.bf16.msra.mxu1 %v1599_v23  ;;  %v1633_v51 = vld [vmem:[%s2427_s3 + $0xf4] ss:$8 sps:$4 sm:$0xff]   ;;  %v1635_v52 = vld [vmem:[%s2427_s3 + $0xf0] ss:$8 sps:$4 sm:$0xff]   ;;  %v338_v56 = vld [vmem:[%s2426_s2] sm:$0x3] }
  0x21   : > { %464 = vmatprep.subr.bf16.mxu0 %v1575_v11  ;;  %859 = vmatprep.subr.bf16.mxu1 %v1600_v25  ;;  %v2135_v58 = vrot.slane %v338_v56, %v2126_v55  ;;  %v2138_v59 = vrot.slane %v338_v56, %v2132_v57  ;;  %v1642_v53 = vld [vmem:[%s2429_s5 + $0x58] sm:$0xff]   ;;  %s293_s10 = scalar_lea.vmem [#allocation3], %s292_s15  ;;  %s1288_s23 = scalar_lea.sflag [#allocation4], %s292_s15 }
  0x22   : > { %s1300_s17 = sshll.u32 %s293_s10, 4  ;;  %s1867_s27 = smov [#allocation3]   ;;  %s2379_s17 = int_to_ptr.vmem [resolvable:$true] %s1300_s17 }
  0x23   : > { %s1784_s21 = scalar_lea.vmem %s2379_s17, 16  ;;  %s1788_s30 = sshll.u32 %s1867_s27, 4  ;;  %s1789_s30 = int_to_ptr.vmem [resolvable:$false] %s1788_s30 }
  0x24   : > { %465 = vmatpush1.bf16.msra.mxu0 %v1577_v16  ;;  %860 = vmatpush1.bf16.msra.mxu1 %v1602_v27  ;;  %p1785_p12 = scmp.ne.s32.totalorder %s2379_s17, %s1784_s21  ;;  %s1790_s8 = scalar_lea.vmem %s1789_s30, 32 }
  0x25   : > { %466 = vmatprep.subr.bf16.mxu0 %v1578_v18  ;;  %861 = vmatprep.subr.bf16.mxu1 %v1603_v28  ;;  %p1791_p1 = scmp.lt.s32.totalorder %s2379_s17, %s1789_s30  ;;  %p1792_p2 = scmp.lt.s32.totalorder %s1790_s8, %s1784_s21 }
  0x26   : > { %p1786_p13 = pnand %p1785_p12, %p1948_p4 }
  0x27   : > { %p1793_p3 = por %p1792_p2, %p1791_p1 }
  0x28   : > { %467 = vmatpush1.bf16.msra.mxu0 %v1580_v19  ;;  %862 = vmatpush1.bf16.msra.mxu1 %v1605_v29  ;;  %p1787_p0 = pneg %p1786_p13 }
  0x29   : > { %468 = vmatprep.subr.bf16.mxu0 %v1581_v21  ;;  %863 = vmatprep.subr.bf16.mxu1 %v1606_v30 }
  0x2a   : > { %p1794_p5 = pnand %p1793_p3, %p1787_p0 }
  0x2c   : > { %469 = vmatpush1.bf16.msra.mxu0 %v1583_v24  ;;  %864 = vmatpush1.bf16.msra.mxu1 %v1608_v32 }
  0x2d   : > { %865 = vmatprep.subr.bf16.mxu1 %v1609_v35 }
  0x2f   : > { %487 = vmatmul.mubr.bf16.vlgmr.msra.gmra.mrb[0].mxu0 %v1584_v26 }
  0x30   : > { %496 = vmatprep.mubr.bf16.mxu0 %v1864_v2  ;;  %866 = vmatpush1.bf16.msra.mxu1 %v1611_v36 }
  0x31   : > { %867 = vmatprep.subr.bf16.mxu1 %v1612_v37 }
  0x34   : > { %868 = vmatpush1.bf16.msra.mxu1 %v1614_v38 }
  0x35   : > { %869 = vmatprep.subr.bf16.mxu1 %v1615_v39 }
  0x37   : > { %497 = vmatmul.mubr.bf16.gmra.mrb[4].mxu0 %v1585_v31 }
  0x38   : > { %506 = vmatprep.mubr.bf16.mxu0 %v1864_v2  ;;  %870 = vmatpush1.bf16.msra.mxu1 %v1617_v40 }
  0x39   : > { %871 = vmatprep.subr.bf16.mxu1 %v1618_v41 }
  0x3c   : > { %872 = vmatpush1.bf16.msra.mxu1 %v1620_v42 }
  0x3d   : > { %873 = vmatprep.subr.bf16.mxu1 %v1621_v43 }
  0x3f   : > { %507 = vmatmul.mubr.bf16.gmra.mrb[8].mxu0 %v1586_v33 }
  0x40   : > { %516 = vmatprep.mubr.bf16.mxu0 %v1864_v2  ;;  %874 = vmatpush1.bf16.msra.mxu1 %v1623_v44 }
  0x41   : > { %875 = vmatprep.subr.bf16.mxu1 %v1624_v45 }
  0x44   : > { %876 = vmatpush1.bf16.msra.mxu1 %v1626_v46 }
  0x45   : > { %877 = vmatprep.subr.bf16.mxu1 %v1627_v47 }
  0x47   : > { %517 = vmatmul.mubr.bf16.gmra.mrb[12].mxu0 %v1587_v34 }
  0x48   : > { %878 = vmatpush1.bf16.msra.mxu1 %v1629_v48 }
  0x49   : > { %879 = vmatprep.subr.bf16.mxu1 %v1630_v49 }
  0x4c   : > { %880 = vmatpush1.bf16.msra.mxu1 %v1632_v50 }
  0x4d   : > { %881 = vmatprep.subr.bf16.mxu1 %v1633_v51 }
  0x50   : > { %882 = vmatpush1.bf16.msra.mxu1 %v1635_v52 }
 0x102   : > { %v488_v60 = vpop.f32.mrb[0].mxu0 }
 0x103   : > { %v2141_v61 = vadd.f32 %v488_v60, %v2135_v58  ;;  %v490_v62 = vpop.f32.mrb[1].mxu0 }
 0x104   : > { %v2144_v63 = vadd.f32 %v490_v62, %v2138_v59  ;;  %v492_v0 = vpop.f32.mrb[2].mxu0 }
 0x105   : > { %v1396_v1 = vmul.f32 -1.442695, %v2141_v61  ;;  %v2148_v2 = vadd.f32 %v492_v0, %v2135_v58  ;;  %v494_v3 = vpop.f32.mrb[3].mxu0 }
 0x106   : > { %v1397_v4 = vmul.f32 -1.442695, %v2144_v63  ;;  %v2152_v5 = vadd.f32 %v494_v3, %v2138_v59 }
 0x107   : > { %1652 = vpow2.f32 %v1396_v1  ;;  %v1398_v6 = vmul.f32 -1.442695, %v2148_v2 }
 0x108   : > { %1654 = vpow2.f32 %v1397_v4  ;;  %v1399_v7 = vmul.f32 -1.442695, %v2152_v5 }
 0x109   : > { %1656 = vpow2.f32 %v1398_v6 }
 0x10a   : > { %1658 = vpow2.f32 %v1399_v7  ;;  %v498_v8 = vpop.f32.mrb[4].mxu0 }
 0x10b   : > { %v2157_v9 = vadd.f32 %v498_v8, %v2135_v58  ;;  %v500_v10 = vpop.f32.mrb[5].mxu0 }
 0x10c   : > { %v2160_v11 = vadd.f32 %v500_v10, %v2138_v59  ;;  %v502_v12 = vpop.f32.mrb[6].mxu0 }
 0x10d   : > { %v1400_v13 = vmul.f32 -1.442695, %v2157_v9  ;;  %v2164_v14 = vadd.f32 %v502_v12, %v2135_v58  ;;  %v504_v15 = vpop.f32.mrb[7].mxu0 }
 0x10e   : > { %v1401_v16 = vmul.f32 -1.442695, %v2160_v11  ;;  %v2168_v17 = vadd.f32 %v504_v15, %v2138_v59 }
 0x10f   : > { %1660 = vpow2.f32 %v1400_v13  ;;  %v1402_v18 = vmul.f32 -1.442695, %v2164_v14 }
 0x110   : > { %1662 = vpow2.f32 %v1401_v16  ;;  %v1403_v19 = vmul.f32 -1.442695, %v2168_v17 }
 0x111   : > { %v1653_v20 = vpop.eup %1652  ;;  %1664 = vpow2.f32 %v1402_v18 }
 0x112   : > { %v1655_v21 = vpop.eup %1654  ;;  %v575_v22 = vadd.f32 1.0, %v1653_v20  ;;  %1666 = vpow2.f32 %v1403_v19  ;;  %v508_v23 = vpop.f32.mrb[8].mxu0 }
 0x113   : > { %v1657_v24 = vpop.eup %1656  ;;  %v576_v25 = vadd.f32 1.0, %v1655_v21  ;;  %v2173_v26 = vadd.f32 %v508_v23, %v2135_v58  ;;  %v510_v27 = vpop.f32.mrb[9].mxu0 }
 0x114   : > { %v1659_v28 = vpop.eup %1658  ;;  %1668 = vrcp.f32 %v575_v22  ;;  %v577_v29 = vadd.f32 1.0, %v1657_v24  ;;  %v2176_v30 = vadd.f32 %v510_v27, %v2138_v59  ;;  %v512_v31 = vpop.f32.mrb[10].mxu0 }
 0x115   : > { %1670 = vrcp.f32 %v576_v25  ;;  %v578_v32 = vadd.f32 1.0, %v1659_v28  ;;  %v1404_v33 = vmul.f32 -1.442695, %v2173_v26  ;;  %v2180_v34 = vadd.f32 %v512_v31, %v2135_v58  ;;  %v514_v35 = vpop.f32.mrb[11].mxu0 }
 0x116   : > { %1672 = vrcp.f32 %v577_v29  ;;  %v1405_v36 = vmul.f32 -1.442695, %v2176_v30  ;;  %v2184_v37 = vadd.f32 %v514_v35, %v2138_v59 }
 0x117   : > { %1674 = vrcp.f32 %v578_v32  ;;  %v1406_v38 = vmul.f32 -1.442695, %v2180_v34 }
 0x118   : > { %1676 = vpow2.f32 %v1404_v33  ;;  %v1407_v39 = vmul.f32 -1.442695, %v2184_v37 }
 0x119   : > { %v1661_v40 = vpop.eup %1660  ;;  %1678 = vpow2.f32 %v1405_v36 }
 0x11a   : > { %v1663_v41 = vpop.eup %1662  ;;  %v579_v42 = vadd.f32 1.0, %v1661_v40  ;;  %1680 = vpow2.f32 %v1406_v38  ;;  %v518_v43 = vpop.f32.mrb[12].mxu0 }
 0x11b   : > { %v1665_v44 = vpop.eup %1664  ;;  %v580_v45 = vadd.f32 1.0, %v1663_v41  ;;  %1682 = vpow2.f32 %v1407_v39  ;;  %v2189_v46 = vadd.f32 %v518_v43, %v2135_v58  ;;  %v520_v47 = vpop.f32.mrb[13].mxu0 }
 0x11c   : > { %v1667_v48 = vpop.eup %1666  ;;  %1684 = vrcp.f32 %v579_v42  ;;  %v581_v49 = vadd.f32 1.0, %v1665_v44  ;;  %v2192_v50 = vadd.f32 %v520_v47, %v2138_v59  ;;  %v522_v51 = vpop.f32.mrb[14].mxu0 }
 0x11d   : > { %1686 = vrcp.f32 %v580_v45  ;;  %v582_v52 = vadd.f32 1.0, %v1667_v48  ;;  %v1408_v56 = vmul.f32 -1.442695, %v2189_v46  ;;  %v2196_v60 = vadd.f32 %v522_v51, %v2135_v58  ;;  %v524_v62 = vpop.f32.mrb[15].mxu0 }
 0x11e   : > { %v1669_v0 = vpop.eup %1668  ;;  %1688 = vrcp.f32 %v581_v49  ;;  %v1409_v1 = vmul.f32 -1.442695, %v2192_v50  ;;  %v2200_v3 = vadd.f32 %v524_v62, %v2138_v59 }
 0x11f   : > { %v1671_v4 = vpop.eup %1670  ;;  %1690 = vrcp.f32 %v582_v52  ;;  %v1410_v6 = vmul.f32 -1.442695, %v2196_v60  ;;  %v623_v58 = vmul.f32 %v1669_v0, %v2141_v61 }
 0x120   : > { %v1673_v7 = vpop.eup %1672  ;;  %1692 = vpow2.f32 %v1408_v56  ;;  %v1411_v8 = vmul.f32 -1.442695, %v2200_v3  ;;  %v624_v15 = vmul.f32 %v1671_v4, %v2144_v63 }
 0x121   : > { %v1675_v10 = vpop.eup %1674  ;;  %v625_v12 = vmul.f32 %v1673_v7, %v2148_v2  ;;  %1694 = vpow2.f32 %v1409_v1  ;;  %v1637_v7 = vld [vmem:[%s2429_s5] sm:$0xff]  }
 0x122   : > { %v1677_v13 = vpop.eup %1676  ;;  %1696 = vpow2.f32 %v1410_v6  ;;  %v626_v59 = vmul.f32 %v1675_v10, %v2152_v5  ;;  %v1641_v10 = vld [vmem:[%s2429_s5 + $0x10] sm:$0xff]  }
 0x123   : > { %v1679_v16 = vpop.eup %1678  ;;  %v583_v18 = vadd.f32 1.0, %v1677_v13  ;;  %1698 = vpow2.f32 %v1411_v8  ;;  %v639_v19 = vpack.c.bf16 %v625_v12, %v623_v58  ;;  %v1865_v8 = vmov 0.0   ;;  %v1643_v58 = vld [vmem:[%s2429_s5 + $0x18] sm:$0xff]   ;;  %v1644_v12 = vld [vmem:[%s2429_s5 + $0x60] sm:$0xff]  }
 0x124   : > { %v1681_v20 = vpop.eup %1680  ;;  %v584_v21 = vadd.f32 1.0, %v1679_v16  ;;  %v640_v22 = vpack.c.bf16 %v626_v59, %v624_v15  ;;  %313 = vst.msk [vmem:[#allocation2] sm:$0x3] %vm2233_vm0, %v1865_v8  ;;  %v1645_v13 = vld [vmem:[%s2429_s5 + $0x20] sm:$0xff]   ;;  %v1646_v15 = vld [vmem:[%s2429_s5 + $0x68] sm:$0xff]   ;;  %v1648_v16 = vld [vmem:[%s2429_s5 + $0x70] sm:$0xff]  }
 0x125   : > { %v1683_v23 = vpop.eup %1682  ;;  %1700 = vrcp.f32 %v583_v18  ;;  %v585_v24 = vadd.f32 1.0, %v1681_v20  ;;  %v1647_v59 = vld [vmem:[%s2429_s5 + $0x28] sm:$0xff]   ;;  %v1649_v18 = vld [vmem:[%s2429_s5 + $0x30] sm:$0xff]   ;;  %v1651_v20 = vld [vmem:[%s2429_s5 + $0x38] sm:$0xff]  }
 0x126   : > { %v1685_v61 = vpop.eup %1684  ;;  %1702 = vrcp.f32 %v584_v21  ;;  %v586_v2 = vadd.f32 1.0, %v1683_v23  ;;  %883 = vmatprep.mubr.bf16.mxu1 %v640_v22  ;;  %v679_v21 = vld [vmem:[%s2428_s4] sm:$0x3] }
 0x127   : > { %v1687_v25 = vpop.eup %1686  ;;  %1704 = vrcp.f32 %v585_v24  ;;  %884 = vmatmul.mubr.bf16.vlgmr.msra.gmra.mrb[0].mxu1 %v639_v19  ;;  %v627_v27 = vmul.f32 %v1685_v61, %v2157_v9  ;;  %v1650_v19 = vld [vmem:[%s2429_s5 + $0x78] sm:$0xff]   ;;  %v2279_v22 = vrot.slane %v679_v21, %v2126_v55  ;;  %v2282_v23 = vrot.slane %v679_v21, %v2132_v57 }
 0x128   : > { %v1689_v63 = vpop.eup %1688  ;;  %1706 = vrcp.f32 %v586_v2  ;;  %v628_v31 = vmul.f32 %v1687_v25, %v2160_v11 }
 0x129   : > { %v1691_v5 = vpop.eup %1690  ;;  %v629_v28 = vmul.f32 %v1689_v63, %v2164_v14 }
 0x12a   : > { %v1693_v29 = vpop.eup %1692  ;;  %v630_v32 = vmul.f32 %v1691_v5, %v2168_v17 }
 0x12b   : > { %v1695_v33 = vpop.eup %1694  ;;  %v587_v35 = vadd.f32 1.0, %v1693_v29  ;;  %v641_v36 = vpack.c.bf16 %v629_v28, %v627_v27 }
 0x12c   : > { %v1697_v38 = vpop.eup %1696  ;;  %v588_v39 = vadd.f32 1.0, %v1695_v33  ;;  %v642_v40 = vpack.c.bf16 %v630_v32, %v628_v31 }
 0x12d   : > { %v1699_v41 = vpop.eup %1698  ;;  %1708 = vrcp.f32 %v587_v35  ;;  %v589_v42 = vadd.f32 1.0, %v1697_v38 }
 0x12e   : > { %1710 = vrcp.f32 %v588_v39  ;;  %v590_v43 = vadd.f32 1.0, %v1699_v41  ;;  %893 = vmatprep.mubr.bf16.mxu1 %v642_v40 }
 0x12f   : > { %v1701_v9 = vpop.eup %1700  ;;  %1712 = vrcp.f32 %v589_v42  ;;  %894 = vmatmul.mubr.bf16.gmra.mrb[4].mxu1 %v641_v36 }
 0x130   : > { %v1703_v14 = vpop.eup %1702  ;;  %1714 = vrcp.f32 %v590_v43  ;;  %v631_v17 = vmul.f32 %v1701_v9, %v2173_v26 }
 0x131   : > { %v1705_v11 = vpop.eup %1704  ;;  %v632_v47 = vmul.f32 %v1703_v14, %v2176_v30 }
 0x132   : > { %v1707_v44 = vpop.eup %1706  ;;  %v633_v45 = vmul.f32 %v1705_v11, %v2180_v34 }
 0x133   : > { %v634_v48 = vmul.f32 %v1707_v44, %v2184_v37  ;;  %v1636_v37 = vld [vmem:[%s2429_s5 + $0x40] sm:$0xff]  }
 0x134   : > { %v643_v49 = vpack.c.bf16 %v633_v45, %v631_v17  ;;  %1480 = vmatprep.subr.bf16.mxu0 %v1636_v37 }
 0x135   : > { %v644_v51 = vpack.c.bf16 %v634_v48, %v632_v47  ;;  %1481 = vmatpush3.bf16.msra.mxu0 %v1637_v7 }
 0x137   : > { %v1709_v52 = vpop.eup %1708  ;;  %903 = vmatprep.mubr.bf16.mxu1 %v644_v51 }
 0x138   : > { %v1711_v56 = vpop.eup %1710  ;;  %904 = vmatmul.mubr.bf16.gmra.mrb[8].mxu1 %v643_v49  ;;  %v635_v1 = vmul.f32 %v1709_v52, %v2189_v46  ;;  %v1638_v46 = vld [vmem:[%s2429_s5 + $0x48] sm:$0xff]  }
 0x139   : > { %v1713_v62 = vpop.eup %1712  ;;  %v636_v26 = vmul.f32 %v1711_v56, %v2192_v50  ;;  %v1639_v50 = vld [vmem:[%s2429_s5 + $0x8] sm:$0xff]   ;;  %1482 = vmatprep.subr.bf16.mxu0 %v1638_v46 }
 0x13a   : > { %v1715_v0 = vpop.eup %1714  ;;  %v637_v4 = vmul.f32 %v1713_v62, %v2196_v60  ;;  %1483 = vmatpush3.bf16.msra.mxu0 %v1639_v50 }
 0x13b   : > { %v638_v34 = vmul.f32 %v1715_v0, %v2200_v3  ;;  %v1640_v3 = vld [vmem:[%s2429_s5 + $0x50] sm:$0xff]  }
 0x13c   : > { %v645_v6 = vpack.c.bf16 %v637_v4, %v635_v1  ;;  %1484 = vmatprep.subr.bf16.mxu0 %v1640_v3 }
 0x13d   : > { %v646_v30 = vpack.c.bf16 %v638_v34, %v636_v26 }
 0x13e   : > { %1485 = vmatpush3.bf16.msra.mxu0 %v1641_v10 }
 0x13f   : > { %913 = vmatprep.mubr.bf16.mxu1 %v646_v30  ;;  %1486 = vmatprep.subr.bf16.mxu0 %v1642_v53 }
 0x140   : > { %914 = vmatmul.mubr.bf16.gmra.mrb[12].mxu1 %v645_v6 }
 0x142   : > { %1487 = vmatpush3.bf16.msra.mxu0 %v1643_v58 }
 0x143   : > { %1488 = vmatprep.subr.bf16.mxu0 %v1644_v12 }
 0x146   : > { %1489 = vmatpush3.bf16.msra.mxu0 %v1645_v13 }
 0x147   : > { %1490 = vmatprep.subr.bf16.mxu0 %v1646_v15 }
 0x14a   : > { %1491 = vmatpush3.bf16.msra.mxu0 %v1647_v59 }
 0x14b   : > { %1492 = vmatprep.subr.bf16.mxu0 %v1648_v16 }
 0x14e   : > { %1493 = vmatpush3.bf16.msra.mxu0 %v1649_v18 }
 0x14f   : > { %1494 = vmatprep.subr.bf16.mxu0 %v1650_v19 }
 0x152   : > { %1495 = vmatpush3.bf16.msra.mxu0 %v1651_v20 }
 0x1fa   : > { %v885_v24 = vpop.f32.mrb[0].mxu1 }
 0x1fb   : > { %v2285_v61 = vadd.f32 %v885_v24, %v2279_v22  ;;  %v887_v2 = vpop.f32.mrb[1].mxu1 }
 0x1fc   : > { %v2288_v25 = vadd.f32 %v887_v2, %v2282_v23  ;;  %v889_v63 = vpop.f32.mrb[2].mxu1 }
 0x1fd   : > { %v1444_v5 = vmul.f32 -1.442695, %v2285_v61  ;;  %v2292_v27 = vadd.f32 %v889_v63, %v2279_v22  ;;  %v891_v28 = vpop.f32.mrb[3].mxu1 }
 0x1fe   : > { %v1445_v29 = vmul.f32 -1.442695, %v2288_v25  ;;  %v2296_v31 = vadd.f32 %v891_v28, %v2282_v23 }
 0x1ff   : > { %1716 = vpow2.f32 %v1444_v5  ;;  %v1446_v32 = vmul.f32 -1.442695, %v2292_v27 }
 0x200   : > { %1718 = vpow2.f32 %v1445_v29  ;;  %v1447_v33 = vmul.f32 -1.442695, %v2296_v31 }
 0x201   : > { %1720 = vpow2.f32 %v1446_v32 }
 0x202   : > { %1722 = vpow2.f32 %v1447_v33  ;;  %v895_v35 = vpop.f32.mrb[4].mxu1 }
 0x203   : > { %v2301_v36 = vadd.f32 %v895_v35, %v2279_v22  ;;  %v897_v38 = vpop.f32.mrb[5].mxu1 }
 0x204   : > { %v2304_v39 = vadd.f32 %v897_v38, %v2282_v23  ;;  %v899_v40 = vpop.f32.mrb[6].mxu1 }
 0x205   : > { %v1448_v41 = vmul.f32 -1.442695, %v2301_v36  ;;  %v2308_v42 = vadd.f32 %v899_v40, %v2279_v22  ;;  %v901_v43 = vpop.f32.mrb[7].mxu1 }
 0x206   : > { %v1449_v9 = vmul.f32 -1.442695, %v2304_v39  ;;  %v2312_v14 = vadd.f32 %v901_v43, %v2282_v23 }
 0x207   : > { %1724 = vpow2.f32 %v1448_v41  ;;  %v1450_v11 = vmul.f32 -1.442695, %v2308_v42 }
 0x208   : > { %1726 = vpow2.f32 %v1449_v9  ;;  %v1451_v44 = vmul.f32 -1.442695, %v2312_v14 }
 0x209   : > { %v1717_v17 = vpop.eup %1716  ;;  %1728 = vpow2.f32 %v1450_v11 }
 0x20a   : > { %v1719_v45 = vpop.eup %1718  ;;  %v972_v47 = vadd.f32 1.0, %v1717_v17  ;;  %1730 = vpow2.f32 %v1451_v44 }
 0x20b   : > { %v1721_v48 = vpop.eup %1720  ;;  %v973_v49 = vadd.f32 1.0, %v1719_v45  ;;  %v905_v51 = vpop.f32.mrb[8].mxu1 }
 0x20c   : > { %v1723_v52 = vpop.eup %1722  ;;  %1732 = vrcp.f32 %v972_v47  ;;  %v974_v56 = vadd.f32 1.0, %v1721_v48  ;;  %v2317_v62 = vadd.f32 %v905_v51, %v2279_v22  ;;  %v907_v0 = vpop.f32.mrb[9].mxu1 }
 0x20d   : > { %1734 = vrcp.f32 %v973_v49  ;;  %v975_v1 = vadd.f32 1.0, %v1723_v52  ;;  %v2320_v4 = vadd.f32 %v907_v0, %v2282_v23  ;;  %v909_v26 = vpop.f32.mrb[10].mxu1 }
 0x20e   : > { %1736 = vrcp.f32 %v974_v56  ;;  %v1452_v34 = vmul.f32 -1.442695, %v2317_v62  ;;  %v2324_v6 = vadd.f32 %v909_v26, %v2279_v22  ;;  %v911_v30 = vpop.f32.mrb[11].mxu1 }
 0x20f   : > { %1738 = vrcp.f32 %v975_v1  ;;  %v1453_v37 = vmul.f32 -1.442695, %v2320_v4  ;;  %v2328_v7 = vadd.f32 %v911_v30, %v2282_v23 }
 0x210   : > { %1740 = vpow2.f32 %v1452_v34  ;;  %v1454_v46 = vmul.f32 -1.442695, %v2324_v6 }
 0x211   : > { %v1725_v50 = vpop.eup %1724  ;;  %1742 = vpow2.f32 %v1453_v37  ;;  %v1455_v3 = vmul.f32 -1.442695, %v2328_v7 }
 0x212   : > { %v1727_v8 = vpop.eup %1726  ;;  %v976_v10 = vadd.f32 1.0, %v1725_v50  ;;  %1744 = vpow2.f32 %v1454_v46 }
 0x213   : > { %v1729_v53 = vpop.eup %1728  ;;  %v977_v58 = vadd.f32 1.0, %v1727_v8  ;;  %1746 = vpow2.f32 %v1455_v3  ;;  %v915_v12 = vpop.f32.mrb[12].mxu1 }
 0x214   : > { %v1731_v13 = vpop.eup %1730  ;;  %1748 = vrcp.f32 %v976_v10  ;;  %v978_v15 = vadd.f32 1.0, %v1729_v53  ;;  %v2333_v59 = vadd.f32 %v915_v12, %v2279_v22  ;;  %v917_v16 = vpop.f32.mrb[13].mxu1 }
 0x215   : > { %1750 = vrcp.f32 %v977_v58  ;;  %v979_v18 = vadd.f32 1.0, %v1731_v13  ;;  %v2336_v19 = vadd.f32 %v917_v16, %v2282_v23  ;;  %v919_v20 = vpop.f32.mrb[14].mxu1 }
 0x216   : > { %v1733_v21 = vpop.eup %1732  ;;  %1752 = vrcp.f32 %v978_v15  ;;  %v1456_v24 = vmul.f32 -1.442695, %v2333_v59  ;;  %v2340_v2 = vadd.f32 %v919_v20, %v2279_v22  ;;  %v921_v63 = vpop.f32.mrb[15].mxu1 }
 0x217   : > { %v1735_v5 = vpop.eup %1734  ;;  %1754 = vrcp.f32 %v979_v18  ;;  %v1457_v28 = vmul.f32 -1.442695, %v2336_v19  ;;  %v2344_v29 = vadd.f32 %v921_v63, %v2282_v23  ;;  %v1020_v38 = vmul.f32 %v1733_v21, %v2285_v61 }
 0x218   : > { %v1737_v32 = vpop.eup %1736  ;;  %1756 = vpow2.f32 %v1456_v24  ;;  %v1458_v33 = vmul.f32 -1.442695, %v2340_v2  ;;  %v1021_v43 = vmul.f32 %v1735_v5, %v2288_v25 }
 0x219   : > { %v1739_v35 = vpop.eup %1738  ;;  %v1022_v40 = vmul.f32 %v1737_v32, %v2292_v27  ;;  %1758 = vpow2.f32 %v1457_v28  ;;  %v1459_v22 = vmul.f32 -1.442695, %v2344_v29 }
 0x21a   : > { %v1741_v41 = vpop.eup %1740  ;;  %v1023_v9 = vmul.f32 %v1739_v35, %v2296_v31  ;;  %1760 = vpow2.f32 %v1458_v33 }
 0x21b   : > { %v1743_v23 = vpop.eup %1742  ;;  %v1037_v11 = vadd.f32 %v1022_v40, %v1020_v38  ;;  %v980_v44 = vadd.f32 1.0, %v1741_v41  ;;  %1762 = vpow2.f32 %v1459_v22 }
 0x21c   : > { %v1745_v17 = vpop.eup %1744  ;;  %v1050_v45 = vadd.f32 %v1023_v9, %v1021_v43  ;;  %v981_v47 = vadd.f32 1.0, %v1743_v23 }
 0x21d   : > { %v1747_v48 = vpop.eup %1746  ;;  %1764 = vrcp.f32 %v980_v44  ;;  %v982_v61 = vadd.f32 1.0, %v1745_v17 }
 0x21e   : > { %v1749_v27 = vpop.eup %1748  ;;  %1766 = vrcp.f32 %v981_v47  ;;  %v983_v49 = vadd.f32 1.0, %v1747_v48 }
 0x21f   : > { %v1751_v51 = vpop.eup %1750  ;;  %v1024_v52 = vmul.f32 %v1749_v27, %v2301_v36  ;;  %1768 = vrcp.f32 %v982_v61 }
 0x220   : > { %v1753_v25 = vpop.eup %1752  ;;  %v1025_v31 = vmul.f32 %v1751_v51, %v2304_v39  ;;  %1770 = vrcp.f32 %v983_v49 }
 0x221   : > { %v1755_v56 = vpop.eup %1754  ;;  %v1038_v0 = vadd.f32 %v1037_v11, %v1024_v52  ;;  %v1026_v1 = vmul.f32 %v1753_v25, %v2308_v42  ;;  %v1866_v11 = vmov 1966171168   ;;  %v1036_v52 = vld [vmem:[#allocation2] sm:$0x3] }
 0x222   : > { %v1757_v26 = vpop.eup %1756  ;;  %v1051_v34 = vadd.f32 %v1050_v45, %v1025_v31  ;;  %v1027_v30 = vmul.f32 %v1755_v56, %v2312_v14  ;;  %v1067_v44 = vunpack.c.l.s4 %v1866_v11 }
 0x223   : > { %v1759_v37 = vpop.eup %1758  ;;  %v1039_v46 = vadd.f32 %v1038_v0, %v1026_v1  ;;  %v984_v50 = vadd.f32 1.0, %v1757_v26 }
 0x224   : > { %v1761_v3 = vpop.eup %1760  ;;  %v1052_v8 = vadd.f32 %v1051_v34, %v1027_v30  ;;  %v985_v10 = vadd.f32 1.0, %v1759_v37 }
 0x225   : > { %v1763_v36 = vpop.eup %1762  ;;  %1772 = vrcp.f32 %v984_v50  ;;  %v986_v53 = vadd.f32 1.0, %v1761_v3 }
 0x226   : > { %1774 = vrcp.f32 %v985_v10  ;;  %v987_v39 = vadd.f32 1.0, %v1763_v36 }
 0x227   : > { %v1765_v58 = vpop.eup %1764  ;;  %1776 = vrcp.f32 %v986_v53 }
 0x228   : > { %v1767_v12 = vpop.eup %1766  ;;  %v1028_v42 = vmul.f32 %v1765_v58, %v2317_v62  ;;  %1778 = vrcp.f32 %v987_v39 }
 0x229   : > { %v1769_v13 = vpop.eup %1768  ;;  %v1029_v14 = vmul.f32 %v1767_v12, %v2320_v4 }
 0x22a   : > { %v1771_v15 = vpop.eup %1770  ;;  %v1040_v16 = vadd.f32 %v1039_v46, %v1028_v42  ;;  %v1030_v18 = vmul.f32 %v1769_v13, %v2324_v6  ;;  %v1137_v46 = vld [vmem:[%s2430_s6] sm:$0x1] }
 0x22b   : > { %v1053_v20 = vadd.f32 %v1052_v8, %v1029_v14  ;;  %v1031_v21 = vmul.f32 %v1771_v15, %v2328_v7 }
 0x22c   : > { %v1041_v24 = vadd.f32 %v1040_v16, %v1030_v18 }
 0x22d   : > { %v1054_v63 = vadd.f32 %v1053_v20, %v1031_v21 }
 0x22f   : > { %v1773_v5 = vpop.eup %1772 }
 0x230   : > { %v1775_v28 = vpop.eup %1774  ;;  %v1032_v32 = vmul.f32 %v1773_v5, %v2333_v59 }
 0x231   : > { %v1777_v33 = vpop.eup %1776  ;;  %v1033_v62 = vmul.f32 %v1775_v28, %v2336_v19  ;;  %v1068_v19 = vunpack.c.0.s8 %v1067_v44 }
 0x232   : > { %v1779_v35 = vpop.eup %1778  ;;  %v1042_v38 = vadd.f32 %v1041_v24, %v1032_v32  ;;  %v1034_v4 = vmul.f32 %v1777_v33, %v2340_v2 }
 0x233   : > { %v1055_v40 = vadd.f32 %v1054_v63, %v1033_v62  ;;  %v1035_v22 = vmul.f32 %v1779_v35, %v2344_v29  ;;  %v1071_v49 = vsub.s32 %v1068_v19, %v2123_v54 }
 0x234   : > { %v1043_v6 = vadd.f32 %v1042_v38, %v1034_v4 }
 0x235   : > { %v1056_v41 = vadd.f32 %v1055_v40, %v1035_v22 }
 0x236   : > { %v1044_v43 = vrot.slane %v1043_v6, 4 }
 0x237   : > { %v1057_v7 = vrot.slane %v1056_v41, 4 }
 0x238   : > { %v1045_v9 = vadd.f32 %v1044_v43, %v1043_v6 }
 0x239   : > { %v1058_v23 = vadd.f32 %v1057_v7, %v1056_v41 }
 0x23a   : > { %v1046_v17 = vrot.slane %v1045_v9, 2 }
 0x23b   : > { %v1059_v59 = vrot.slane %v1058_v23, 2 }
 0x23c   : > { %v1047_v45 = vadd.f32 %v1046_v17, %v1045_v9 }
 0x23d   : > { %v1060_v47 = vadd.f32 %v1059_v59, %v1058_v23 }
 0x23e   : > { %v1048_v48 = vrot.slane %v1047_v45, 1 }
 0x23f   : > { %v1061_v61 = vrot.slane %v1060_v47, 1 }
 0x240   : > { %v1049_v27 = vadd.f32 %v1048_v48, %v1047_v45 }
 0x241   : > { %v1062_v2 = vadd.f32 %v1061_v61, %v1060_v47 }
 0x243   : > { %v1065_v29 = vcombine.low %v1049_v27, %v1062_v2 }
 0x245   : > { %v1072_v51 = vrot.slane %v1065_v29, %v1071_v49 }
 0x247   : > { %v1079_v25 = vrot.slane %v1072_v51, %v1071_v49 }
 0x249   : > { %v1081_v31 = vadd.f32 %v1079_v25, %v1036_v52 }
 0x24b   : > { %1086 = vst.msk [vmem:[#allocation2] sm:$0x3] %vm2233_vm0, %v1081_v31 }
 0x252   : > { %v1090_v56 = vld [vmem:[#allocation2] sm:$0x3] }
 0x253   : > { %v1091_v0 = vmul.f32 0.015625, %v1090_v56 }
 0x255   : > { %v1096_v1 = vrot.slane %v1091_v0, %v2126_v55  ;;  %v1100_v26 = vrot.slane %v1091_v0, %v2132_v57 }
 0x257   : > { %v1103_v34 = vpack.c.bf16 %v1096_v1, %v1096_v1  ;;  %v1104_v30 = vpack.c.bf16 %v1100_v26, %v1100_v26 }
 0x259   : > { %1266 = vmatprep.mubr.bf16.mxu0 %v1104_v30 }
 0x25a   : > { %1267 = vmatmul.mubr.bf16.vlgmr.msra.gmra.mrb[16].mxu0 %v1103_v34 }
 0x32d   : > { %v1496_v37 = vpop.f32.mrb[16].mxu0 }
 0x32e   : > { %v1497_v54 = vpop.f32.mrb[17].mxu0 }
 0x32f   : > { %v1498_v50 = vadd.f32 %v1497_v54, %v1496_v37  ;;  %v1499_v60 = vpop.f32.mrb[18].mxu0 }
 0x330   : > { %v1500_v3 = vpop.f32.mrb[19].mxu0 }
 0x331   : > { %v1269_v8 = vadd.f32 %v1498_v50, %v1137_v46 }
 0x333   : > { %v1275_v55 = vsel %vm1274_vm1, %v1269_v8, -inf }
 0x334   : > { %1276 = vmax.xlane.f32.xlu0 %v1275_v55 }
 0x3c1   : > { %v1277_v57 = vpop.xlane.xlu0 %1276 }
 0x3c2   : > { %v1278_v10 = vsub.f32 %v1269_v8, %v1277_v57 }
 0x3c4   : > { %v1279_v36 = vmul.f32 1.442695, %v1278_v10 }
 0x3c6   : > { %1780 = vpow2.f32 %v1279_v36 }
 0x3d0   : > { %v1781_v53 = vpop.eup %1780 }
 0x3d1   : > { %v1281_v39 = vsel %vm1274_vm1, %v1781_v53, 0.0 }
 0x3d2   : > { %1282 = vadd.xlane.f32.xlu0 %v1281_v39 }
 0x45f   : > { %v1283_v58 = vpop.xlane.xlu0 %1282 }
 0x460   : > { %1782 = vrcp.f32 %v1283_v58 }
 0x46a   : > { %v1783_v12 = vpop.eup %1782 }
 0x46b   : > { %v1285_v42 = vmul.f32 %v1783_v12, %v1781_v53 }
 0x46d   : > { %1286 = vst [vmem:[%s293_s10] sm:$0x1] %v1285_v42 }
 0x46e   : > { %1797 = shalt.err (!%p1794_p5)
}
 0x46f   : > { %s1798_s12 = scalar_lea.hbm %s2377_s22, 16  ;;  %s1802_s16 = scalar_lea.hbm %s2431_s7, 32 }
 0x470   : > { %p1799_p6 = scmp.ne.s32.totalorder %s2377_s22, %s1798_s12  ;;  %p1803_p10 = scmp.lt.u32.totalorder %s2377_s22, %s2431_s7 }
 0x471   : > { %p1804_p11 = scmp.lt.u32.totalorder %s1802_s16, %s1798_s12  ;;  %p1806_p13 = scmp.lt.u32.totalorder %s1798_s12, %s2377_s22 }
 0x472   : > { %p1800_p7 = pnand %p1799_p6, %p1948_p4 }
 0x473   : > { %p1805_p12 = por %p1804_p11, %p1803_p10 }
 0x474   : > { %p1801_p9 = pneg %p1800_p7 }
 0x475   : > { %p1807_p0 = por %p1806_p13, %p1805_p12 }
 0x477   : > { %p1808_p1 = pnand %p1807_p0, %p1801_p9 }
 0x479   : > { %1811 = shalt.err (!%p1808_p1)
}
 0x47a   : > { %1502 = dma.vmem_to_hbm [thread:$0]  (%p1948_p4), %s2379_s17, 16, %s2377_s22, %s1288_s23  }
 0x47b PF: > { %p1508_p2 = scmp.ge.s32.totalorder %s1862_s29, 2  ;;  %s1312_s19 = sand.u32 1, %s1842_s24  }
 0x47c   : > { %s1313_s21 = scalar_lea.sflag [#allocation4], %s1312_s19 }
 0x47d   : > { %p1505_p3 = pnand %p1508_p2, %p1955_p8 }
 0x47f   : > { %1837 = dma.done.wait (!%p1505_p3), %s1313_s21, 16  }
 0x480   : > { %1839 = vsyncadd (!%p1505_p3), %s1313_s21, 4294967280  ;;  %s20_s29 = sadd.s32 1, %s1862_s29   ;;  %s2436_s24 = smov %s1846_s25 }
 0x481   : > { %p17_p5 = scmp.ge.s32.totalorder %s20_s29, 4   ;;  %s2437_s25 = smov %s1850_s26 }
 0x482   : > { %s2438_s26 = smov %s1961_s14  ;;  %s2439_s27 = smov %s1858_s28 }
 0x483   : > { %s2440_s28 = smov %s2442_s9  ;;  %19 = sbr.rel (!%p17_p5) target bundleno = 4 (0x4), region = 91 }
 0x48a   :  { %1317 = vsyncpa [#allocation4], 1 }
 0x48b   :  { %1319 = vsyncpa [#allocation4 + $0x1], 1 }

// kernel: efficientnet_forward.2
= control target key start
LH: loop header
LB: loop body
LE: loop exit
PB: predicated region body
PF: predicated region fallthrough
CT: control target
= control target key end

     0   :  { %s2117_s27 = smov 0   ;;  %s2922_s0 = inlined_call_operand.vmem [shape: bf16[2,9,9,3], index: 0, kind: input, shape index: {}]   ;;  %s2923_s1 = inlined_call_operand.vmem [shape: bf16[2,9,9,3], index: 1, kind: input, shape index: {}]   ;;  %s2924_s2 = inlined_call_operand.vmem [shape: bf16[2,9,9,3], index: 2, kind: input, shape index: {}]   ;;  %s2925_s3 = inlined_call_operand.vmem [shape: bf16[2,9,9,3], index: 3, kind: input, shape index: {}]   ;;  %s2926_s4 = inlined_call_operand.vmem [shape: bf16[27,128], index: 4, kind: input, shape index: {}]   ;;  %s2927_s5 = inlined_call_operand.vmem [shape: f32[1,128], index: 5, kind: input, shape index: {}]   ;;  %s2928_s6 = inlined_call_operand.vmem [shape: f32[9,128], index: 6, kind: input, shape index: {}]   ;;  %s2929_s7 = inlined_call_operand.vmem [shape: f32[1,128], index: 7, kind: input, shape index: {}]   ;;  %s2930_s8 = inlined_call_operand.vmem [shape: bf16[2,8,8,128], index: 8, kind: output, shape index: {}]  }
   0x1 LB: > { %s1825_s28 = sadd.s32 4294967295, %s2060_s27   ;;  %p1829_p0 = scmp.ge.s32.totalorder %s2060_s27, 1  ;;  %s2060_s27 = sphi %s2117_s27, %s18_s27  }
   0x2   : > { %p292_p1 = scmp.lt.s32.totalorder %s2060_s27, 3 }
   0x4   : > { %p293_p2 = pnand %p1829_p0, %p292_p1 }
   0x5   : > { %p341_p3 = scmp.lt.s32.totalorder (!%p293_p2), %s1825_s28, 1  ;;  %vm418_vm0 = vsmask.f32 (!%p293_p2), 3328  ;;  %vm419_vm1 = vsmask.f32 (!%p293_p2), 7440  ;;  %s2062_s17 = smov (!%p293_p2), 3  }
   0x6   : > { %296 = sbr.rel (%p293_p2) target bundleno = 573 (0x23d), region = 52  ;;  %s2063_s18 = smov (!%p293_p2), 9   ;;  %vm2227_vm2 = vmor (!%p293_p2), %vm418_vm0, %vm419_vm1  ;;  %vm951_vm3 = vcmask (!%p293_p2), 1044480   ;;  %vm952_vm4 = vcmask (!%p293_p2), 1045504   ;;  %vm857_vm5 = vcmask (!%p293_p2), 48128   ;;  %vm844_vm6 = vcmask (!%p293_p2), 23552  }
   0x7   : > { %s2064_s19 = smov (!%p293_p2), 6   ;;  %s2065_s23 = smov (!%p293_p2), 12   ;;  %vm866_vm7 = vcmask (!%p293_p2), 72704   ;;  %vm875_vm8 = vcmask (!%p293_p2), 97280   ;;  %vm884_vm9 = vcmask (!%p293_p2), 121856   ;;  %vm893_vm10 = vcmask (!%p293_p2), 146432  }
   0x8   : > { %s2066_s24 = smov (!%p293_p2), 15   ;;  %s2067_s25 = smov (!%p293_p2), 18   ;;  %vm902_vm11 = vcmask (!%p293_p2), 171008   ;;  %vm911_vm12 = vcmask (!%p293_p2), 195584   ;;  %vm942_vm13 = vcmask (!%p293_p2), 220160   ;;  %vm1186_vm14 = vcmask (!%p293_p2), 1046528  }
   0x9   : > { %s2069_s11 = smov (!%p293_p2), 21  }
   0xd   : > { %s2937_s28 = smov (!%p341_p3, %s1825_s28), 1 }
   0xe   : > { %s2128_s29 = smul.u32 72, %s2937_s28  ;;  %s1899_s20 = sshll.u32 %s2937_s28, 5 }
  0x10   : > { %s2134_s10 = scalar_lea.vmem %s2923_s1, %s2128_s29  ;;  %s2140_s13 = scalar_lea.vmem %s2924_s2, %s2128_s29 }
  0x11   : > { %v2143_v0 = vld [vmem:[%s2134_s10 + $0x10] sm:$0xf]  ;;  %v2146_v1 = vld [vmem:[%s2134_s10 + $0x18] sm:$0xf]  ;;  %v2149_v2 = vld [vmem:[%s2134_s10 + $0x20] sm:$0xf]  ;;  %s2164_s16 = scalar_lea.vmem %s2922_s0, %s2128_s29  ;;  %s2268_s22 = scalar_lea.vmem %s2925_s3, %s2128_s29 }
  0x12   : > { %v1841_v3 = vcombine.low %v2143_v0, %v2146_v1  ;;  %v385_v4 = vld [vmem:[%s2134_s10] sm:$0xf]  ;;  %v2155_v5 = vld [vmem:[%s2134_s10 + $0x8] sm:$0xf]  ;;  %v2158_v6 = vld [vmem:[%s2134_s10 + $0x30] sm:$0xf] }
  0x13   : > { %v1840_v7 = vcombine.low %v385_v4, %v2155_v5  ;;  %v2168_v8 = vld [vmem:[%s2134_s10 + $0x38] sm:$0xf]  ;;  %v2171_v9 = vld [vmem:[%s2134_s10 + $0x28] sm:$0xf]  ;;  %v402_v10 = vld [vmem:[%s2140_s13 + $0x20] sm:$0xf] }
  0x14   : > { %701 = vrot.lane.b32.xlu1 %v1841_v3, %s2062_s17  ;;  %v1843_v11 = vcombine.low %v2158_v6, %v2168_v8  ;;  %v404_v12 = vld [vmem:[%s2140_s13 + $0x28] sm:$0xf]  ;;  %v590_v13 = vshrl.u32 %v402_v10, 16  ;;  %v593_v14 = vshll.u32 %v402_v10, 16  ;;  %v394_v15 = vld [vmem:[%s2140_s13] sm:$0xf]  ;;  %v1842_v16 = vcombine.low %v2149_v2, %v2171_v9 }
  0x15   : > { %699 = vrot.lane.b32.xlu0 %v1840_v7, %s2062_s17  ;;  %v604_v17 = vshrl.u32 %v404_v12, 16  ;;  %v607_v18 = vshll.u32 %v404_v12, 16  ;;  %v396_v19 = vld [vmem:[%s2140_s13 + $0x8] sm:$0xf]  ;;  %v534_v20 = vshrl.u32 %v394_v15, 16  ;;  %v537_v23 = vshll.u32 %v394_v15, 16 }
  0x16   : > { %v2181_v21 = vrot.slane %v590_v13, 4  ;;  %v2183_v22 = vrot.slane %v593_v14, 5  ;;  %v548_v24 = vshrl.u32 %v396_v19, 16  ;;  %v2186_v25 = vld [vmem:[%s2164_s16 + $0x20] sm:$0xf]  ;;  %v551_v29 = vshll.u32 %v396_v19, 16 }
  0x17   : > { %v2188_v26 = vrot.slane %v604_v17, 4  ;;  %v2190_v27 = vrot.slane %v607_v18, 5  ;;  %v2192_v28 = vrot.slane %v534_v20, 4  ;;  %v376_v30 = vld [vmem:[%s2164_s16 + $0x24] sm:$0x1]  ;;  %v1850_v31 = vcombine.low %v402_v10, %v404_v12 }
  0x18   : > { %705 = vrot.lane.b32.xlu1 %v1843_v11, %s2062_s17  ;;  %v2195_v32 = vrot.slane %v537_v23, 5  ;;  %v2197_v33 = vrot.slane %v548_v24, 4  ;;  %v2200_v34 = vld [vmem:[%s2164_s16 + $0x28] sm:$0xf]  ;;  %v378_v35 = vld [vmem:[%s2164_s16 + $0x2c] sm:$0x1]  ;;  %v1848_v36 = vcombine.low %v394_v15, %v396_v19 }
  0x19   : > { %703 = vrot.lane.b32.xlu0 %v1842_v16, %s2062_s17  ;;  %v478_v37 = vshrl.u32 %v2186_v25, 16  ;;  %v481_v38 = vshll.u32 %v2186_v25, 16  ;;  %v487_v39 = vshll.u32 %v376_v30, 16  ;;  %v2206_v40 = vld [vmem:[%s2164_s16] sm:$0xf]  ;;  %v492_v41 = vshrl.u32 %v2200_v34, 16 }
  0x1a   : > { %v495_v42 = vshll.u32 %v2200_v34, 16  ;;  %v501_v43 = vshll.u32 %v378_v35, 16  ;;  %v368_v44 = vld [vmem:[%s2164_s16 + $0x4] sm:$0x1]  ;;  %v422_v45 = vshrl.u32 %v2206_v40, 16  ;;  %v2212_v46 = vrot.slane %v551_v29, 5 }
  0x1b   : > { %v480_v47 = vrot.slane %v478_v37, 4  ;;  %v483_v48 = vrot.slane %v481_v38, 5  ;;  %v2215_v49 = vld [vmem:[%s2164_s16 + $0x8] sm:$0xf]  ;;  %v425_v50 = vshll.u32 %v2206_v40, 16  ;;  %v489_v51 = vrot.slane %v487_v39, 5 }
  0x1c   : > { %751 = vrot.lane.b32.xlu1 %v1850_v31, %s2063_s18  ;;  %v494_v52 = vrot.slane %v492_v41, 4  ;;  %v497_v53 = vrot.slane %v495_v42, 5  ;;  %v370_v54 = vld [vmem:[%s2164_s16 + $0xc] sm:$0x1]  ;;  %v424_v55 = vrot.slane %v422_v45, 4  ;;  %v431_v58 = vshll.u32 %v368_v44, 16 }
  0x1d   : > { %747 = vrot.lane.b32.xlu0 %v1848_v36, %s2063_s18  ;;  %v484_v56 = vor.u32 %v483_v48, %v480_v47  ;;  %v427_v57 = vrot.slane %v425_v50, 5  ;;  %v436_v59 = vshrl.u32 %v2215_v49, 16  ;;  %v2223_v60 = vld [vmem:[%s2164_s16 + $0x30] sm:$0xf]  ;;  %v503_v63 = vrot.slane %v501_v43, 5 }
  0x1e   : > { %v498_v62 = vor.u32 %v497_v53, %v494_v52  ;;  %v439_v3 = vshll.u32 %v2215_v49, 16  ;;  %v445_v4 = vshll.u32 %v370_v54, 16  ;;  %v380_v7 = vld [vmem:[%s2164_s16 + $0x34] sm:$0x1]  ;;  %v433_v12 = vrot.slane %v431_v58, 5 }
  0x1f   : > { %v485_v10 = vrot.slane %v484_v56, 4  ;;  %v428_v11 = vor.u32 %v427_v57, %v424_v55  ;;  %v438_v13 = vrot.slane %v436_v59, 4  ;;  %v2234_v14 = vld [vmem:[%s2164_s16 + $0x38] sm:$0xf]  ;;  %v506_v18 = vshrl.u32 %v2223_v60, 16 }
  0x20   : > { %v499_v15 = vrot.slane %v498_v62, 4  ;;  %v441_v16 = vrot.slane %v439_v3, 5  ;;  %v447_v17 = vrot.slane %v445_v4, 5  ;;  %v382_v23 = vld [vmem:[%s2164_s16 + $0x3c] sm:$0x1]  ;;  %v509_v24 = vshll.u32 %v2223_v60, 16 }
  0x21   : > { %v2239_v19 = vsel %vm2227_vm2, %v485_v10, %v489_v51  ;;  %v429_v20 = vrot.slane %v428_v11, 4  ;;  %v515_v29 = vshll.u32 %v380_v7, 16  ;;  %v508_v35 = vrot.slane %v506_v18, 4  ;;  %v2249_v37 = vld [vmem:[%s2164_s16 + $0x10] sm:$0xf] }
  0x22   : > { %v2245_v30 = vsel %vm2227_vm2, %v499_v15, %v503_v63  ;;  %v442_v31 = vor.u32 %v441_v16, %v438_v13  ;;  %v520_v36 = vshrl.u32 %v2234_v14, 16  ;;  %v372_v38 = vld [vmem:[%s2164_s16 + $0x14] sm:$0x1]  ;;  %v511_v42 = vrot.slane %v509_v24, 5  ;;  %v2257_v44 = vld [vmem:[%s2164_s16 + $0x18] sm:$0xf] }
  0x23   : > { %v1846_v39 = vcombine.low %v2239_v19, %v2245_v30  ;;  %v434_v41 = vsel %vm2227_vm2, %v429_v20, %v433_v12  ;;  %v517_v43 = vrot.slane %v515_v29, 5  ;;  %v523_v48 = vshll.u32 %v2234_v14, 16  ;;  %v374_v52 = vld [vmem:[%s2164_s16 + $0x1c] sm:$0x1]  ;;  %v406_v62 = vld [vmem:[%s2140_s13 + $0x30] sm:$0xf] }
  0x24   : > { %v443_v45 = vrot.slane %v442_v31, 4  ;;  %v522_v47 = vrot.slane %v520_v36, 4  ;;  %v529_v50 = vshll.u32 %v382_v23, 16  ;;  %v512_v51 = vor.u32 %v511_v42, %v508_v35  ;;  %v408_v15 = vld [vmem:[%s2140_s13 + $0x38] sm:$0xf] }
  0x25   : > { %723 = vrot.lane.b32.xlu1 %v1846_v39, %s2064_s19  ;;  %v450_v53 = vshrl.u32 %v2249_v37, 16  ;;  %v453_v54 = vshll.u32 %v2249_v37, 16  ;;  %v459_v55 = vshll.u32 %v372_v38, 16  ;;  %v525_v57 = vrot.slane %v523_v48, 5  ;;  %v398_v38 = vld [vmem:[%s2140_s13 + $0x10] sm:$0xf] }
  0x26   : > { %v2272_v56 = vsel %vm2227_vm2, %v443_v45, %v447_v17  ;;  %v531_v58 = vrot.slane %v529_v50, 5  ;;  %v464_v59 = vshrl.u32 %v2257_v44, 16  ;;  %v513_v3 = vrot.slane %v512_v51, 4  ;;  %v400_v48 = vld [vmem:[%s2140_s13 + $0x18] sm:$0xf] }
  0x27   : > { %v1844_v63 = vcombine.low %v434_v41, %v2272_v56  ;;  %v452_v4 = vrot.slane %v450_v53, 4  ;;  %v455_v7 = vrot.slane %v453_v54, 5  ;;  %v526_v10 = vor.u32 %v525_v57, %v522_v47 }
  0x28   : > { %v461_v11 = vrot.slane %v459_v55, 5  ;;  %v466_v12 = vrot.slane %v464_v59, 4  ;;  %v467_v13 = vshll.u32 %v2257_v44, 16  ;;  %v2282_v16 = vsel %vm2227_vm2, %v513_v3, %v517_v43  ;;  %v405_v59 = vld [vmem:[%s2140_s13 + $0x2c] sm:$0x1] }
  0x29   : > { %719 = vrot.lane.b32.xlu0 %v1844_v63, %s2064_s19  ;;  %v456_v17 = vor.u32 %v455_v7, %v452_v4  ;;  %v473_v18 = vshll.u32 %v374_v52, 16  ;;  %v618_v20 = vshrl.u32 %v406_v62, 16  ;;  %v527_v23 = vrot.slane %v526_v10, 4  ;;  %v395_v7 = vld [vmem:[%s2140_s13 + $0x4] sm:$0x1] }
  0x2a   : > { %v469_v24 = vrot.slane %v467_v13, 5  ;;  %v621_v29 = vshll.u32 %v406_v62, 16  ;;  %v632_v31 = vshrl.u32 %v408_v15, 16  ;;  %v635_v36 = vshll.u32 %v408_v15, 16  ;;  %v1974_v13 = vld [vmem:[%s2268_s22 + $0x20] ss:$8 sps:$4 sm:$0xff]  }
  0x2b   : > { %v457_v35 = vrot.slane %v456_v17, 4  ;;  %v596_v39 = vor.u32 %v2183_v22, %v2181_v21  ;;  %v610_v41 = vor.u32 %v2190_v27, %v2188_v26  ;;  %v2291_v42 = vsel %vm2227_vm2, %v527_v23, %v531_v58  ;;  %v403_v58 = vld [vmem:[%s2140_s13 + $0x24] sm:$0x1]  ;;  %v397_v17 = vld [vmem:[%s2140_s13 + $0xc] sm:$0x1] }
  0x2c   : > { %v470_v43 = vor.u32 %v469_v24, %v466_v12  ;;  %v475_v45 = vrot.slane %v473_v18, 5  ;;  %v620_v47 = vrot.slane %v618_v20, 4  ;;  %v1847_v50 = vcombine.low %v2282_v16, %v2291_v42 }
  0x2d   : > { %v2298_v51 = vsel %vm2227_vm2, %v457_v35, %v461_v11  ;;  %v623_v21 = vrot.slane %v621_v29, 5  ;;  %v634_v22 = vrot.slane %v632_v31, 4  ;;  %v637_v27 = vrot.slane %v635_v36, 5  ;;  %v407_v29 = vld [vmem:[%s2140_s13 + $0x34] sm:$0x1] }
  0x2e   : > { %v471_v26 = vrot.slane %v470_v43, 4  ;;  %v562_v52 = vshrl.u32 %v398_v38, 16  ;;  %v565_v53 = vshll.u32 %v398_v38, 16  ;;  %725 = vrot.lane.b32.xlu1 %v1847_v50, %s2064_s19  ;;  %v1851_v54 = vcombine.low %v406_v62, %v408_v15  ;;  %v409_v31 = vld [vmem:[%s2140_s13 + $0x3c] sm:$0x1] }
  0x2f   : > { %v576_v55 = vshrl.u32 %v400_v48, 16  ;;  %v579_v57 = vshll.u32 %v400_v48, 16  ;;  %v1849_v3 = vcombine.low %v398_v38, %v400_v48  ;;  %v597_v4 = vrot.slane %v596_v39, 4  ;;  %v1975_v48 = vld [vmem:[%s2268_s22] ss:$8 sps:$4 sm:$0xff]  }
  0x30   : > { %v2305_v63 = vsel %vm2227_vm2, %v471_v26, %v475_v45  ;;  %v540_v10 = vor.u32 %v2195_v32, %v2192_v28  ;;  %v564_v62 = vrot.slane %v562_v52, 4  ;;  %v567_v12 = vrot.slane %v565_v53, 5  ;;  %v399_v45 = vld [vmem:[%s2140_s13 + $0x14] sm:$0x1] }
  0x31   : > { %v1845_v11 = vcombine.low %v2298_v51, %v2305_v63  ;;  %v599_v15 = vshll.u32 %v403_v58, 16  ;;  %v611_v18 = vrot.slane %v610_v41, 4  ;;  %v613_v20 = vshll.u32 %v405_v59, 16 }
  0x32   : > { %v543_v23 = vshll.u32 %v395_v7, 16  ;;  %v554_v24 = vor.u32 %v2212_v46, %v2197_v33  ;;  %753 = vrot.lane.b32.xlu1 %v1851_v54, %s2063_s18  ;;  %v557_v32 = vshll.u32 %v397_v17, 16  ;;  %v624_v35 = vor.u32 %v623_v21, %v620_v47  ;;  %v401_v54 = vld [vmem:[%s2140_s13 + $0x1c] sm:$0x1]  ;;  %v1976_v47 = vld [vmem:[%s2268_s22 + $0x30] ss:$8 sps:$4 sm:$0xff]  }
  0x33   : > { %721 = vrot.lane.b32.xlu0 %v1845_v11, %s2064_s19  ;;  %v601_v28 = vrot.slane %v599_v15, 5  ;;  %v627_v36 = vshll.u32 %v407_v29, 16  ;;  %v578_v38 = vrot.slane %v576_v55, 4  ;;  %v581_v39 = vrot.slane %v579_v57, 5 }
  0x34   : > { %v615_v41 = vrot.slane %v613_v20, 5  ;;  %v638_v43 = vor.u32 %v637_v27, %v634_v22  ;;  %v541_v50 = vrot.slane %v540_v10, 4  ;;  %v545_v33 = vrot.slane %v543_v23, 5 }
  0x35   : > { %v602_v46 = vsel %vm2227_vm2, %v597_v4, %v601_v28  ;;  %v555_v26 = vrot.slane %v554_v24, 4  ;;  %v559_v52 = vrot.slane %v557_v32, 5  ;;  %v641_v53 = vshll.u32 %v409_v31, 16 }
  0x36   : > { %779 = vrot.lane.b32.xlu1 %v1974_v13, %s2065_s23  ;;  %v616_v21 = vsel %vm2227_vm2, %v611_v18, %v615_v41  ;;  %v625_v22 = vrot.slane %v624_v35, 4  ;;  %v629_v27 = vrot.slane %v627_v36, 5  ;;  %v571_v55 = vshll.u32 %v399_v45, 16  ;;  %v383_v41 = vld [vmem:[%s2164_s16 + $0x40] sm:$0xf] }
  0x37   : > { %749 = vrot.lane.b32.xlu0 %v1849_v3, %s2063_s18  ;;  %v639_v57 = vrot.slane %v638_v43, 4  ;;  %v643_v58 = vrot.slane %v641_v53, 5  ;;  %v568_v59 = vor.u32 %v567_v12, %v564_v62  ;;  %v582_v4 = vor.u32 %v581_v39, %v578_v38  ;;  %v1977_v3 = vld [vmem:[%s2268_s22 + $0x10] ss:$8 sps:$4 sm:$0xff]  }
  0x38   : > { %v585_v7 = vshll.u32 %v401_v54, 16  ;;  %v546_v10 = vsel %vm2227_vm2, %v541_v50, %v545_v33  ;;  %v1858_v11 = vcombine.low %v602_v46, %v616_v21  ;;  %v560_v13 = vsel %vm2227_vm2, %v555_v26, %v559_v52  ;;  %v384_v26 = vld [vmem:[%s2164_s16 + $0x44] sm:$0x1] }
  0x39   : > { %v630_v15 = vsel %vm2227_vm2, %v625_v22, %v629_v27  ;;  %v573_v17 = vrot.slane %v571_v55, 5  ;;  %v644_v18 = vsel %vm2227_vm2, %v639_v57, %v643_v58  ;;  %v569_v62 = vrot.slane %v568_v59, 4  ;;  %v1988_v52 = vld [vmem:[%s2926_s4] sm:$0xff]  }
  0x3a   : > { %781 = vrot.lane.b32.xlu1 %v1976_v47, %s2065_s23  ;;  %v583_v12 = vrot.slane %v582_v4, 4  ;;  %v587_v20 = vrot.slane %v585_v7, 5  ;;  %v1856_v23 = vcombine.low %v546_v10, %v560_v13  ;;  %v1859_v24 = vcombine.low %v630_v15, %v644_v18  ;;  %v1989_v47 = vld [vmem:[%s2926_s4 + $0x8] sm:$0x3f]   ;;  %v393_v27 = vld [vmem:[%s2134_s10 + $0x40] sm:$0xf]  ;;  %1929 = vmatprep.subr.bf16.mxu0 %v1988_v52 }
  0x3b   : > { %775 = vrot.lane.b32.xlu0 %v1975_v48, %s2065_s23  ;;  %v1837_v29 = vcombine.low %v2249_v37, %v2257_v44  ;;  %v1836_v28 = vcombine.low %v2206_v40, %v2215_v49  ;;  %v574_v32 = vsel %vm2227_vm2, %v569_v62, %v573_v17  ;;  %v1839_v35 = vcombine.low %v2223_v60, %v2234_v14  ;;  %s2070_s10 = smov 24  }
  0x3c   : > { %v588_v31 = vsel %vm2227_vm2, %v583_v12, %v587_v20  ;;  %v1838_v36 = vcombine.low %v2186_v25, %v2200_v34  ;;  %v1862_v39 = vcombine.low %v2200_v34, %v2223_v60  ;;  %v646_v43 = vshrl.u32 %v383_v41, 16  ;;  %1941 = vmatprep.subr.bf16.mxu1 %v1988_v52  ;;  %1930 = vmatpush3.bf16.msra.mxu0 %v1988_v52 }
  0x3d   : > { %v1857_v38 = vcombine.low %v574_v32, %v588_v31  ;;  %v649_v45 = vshll.u32 %v383_v41, 16  ;;  %v1860_v48 = vcombine.low %v2215_v49, %v2249_v37  ;;  %v1863_v50 = vcombine.low %v2234_v14, %v383_v41  ;;  %1943 = vmatpush3.bf16.msra.mxu1 %v1988_v52 }
  0x3e   : > { %799 = vrot.lane.b32.xlu1 %v1858_v11, %s2066_s24  ;;  %v648_v33 = vrot.slane %v646_v43, 4  ;;  %v1861_v53 = vcombine.low %v2257_v44, %v2186_v25  ;;  %v1866_v54 = vcombine.low %v2171_v9, %v2158_v6  ;;  %v2068_v21 = vmov 65535  }
  0x3f   : > { %777 = vrot.lane.b32.xlu0 %v1977_v3, %s2065_s23  ;;  %v651_v46 = vrot.slane %v649_v45, 5  ;;  %v953_v22 = vsel %vm951_vm3, 4294967295, %v2068_v21  ;;  %v655_v57 = vshll.u32 %v384_v26, 16  ;;  %v1864_v6 = vcombine.low %v2155_v5, %v2143_v0  ;;  %s365_s23 = scalar_lea.vmem %s2930_s8, %s1899_s20 }
  0x40   : > { %v954_v58 = vsel %vm952_vm4, %v953_v22, 0  ;;  %v1867_v9 = vcombine.low %v2168_v8, %v393_v27  ;;  %v1865_v10 = vcombine.low %v2146_v1, %v2149_v2  ;;  %v1870_v3 = vcombine.low %v2245_v30, %v2282_v16 }
  0x41   : > { %v652_v55 = vor.u32 %v651_v46, %v648_v33  ;;  %v956_v59 = vand.u32 %v1989_v47, %v954_v58  ;;  %v657_v7 = vrot.slane %v655_v57, 5  ;;  %v1868_v5 = vcombine.low %v2272_v56, %v2298_v51 }
  0x42   : > { %801 = vrot.lane.b32.xlu1 %v1859_v24, %s2066_s24  ;;  %v1869_v1 = vcombine.low %v2305_v63, %v2239_v19 }
  0x43   : > { %795 = vrot.lane.b32.xlu0 %v1856_v23, %s2066_s24  ;;  %v653_v4 = vrot.slane %v652_v55, 4  ;;  %1931 = vmatprep.subr.bf16.mxu0 %v956_v59 }
  0x44   : > { %1942 = vmatprep.subr.bf16.mxu1 %v956_v59  ;;  %1932 = vmatpush3.bf16.msra.mxu0 %v956_v59 }
  0x45   : > { %1944 = vmatpush3.bf16.msra.mxu1 %v956_v59  ;;  %v658_v0 = vsel %vm2227_vm2, %v653_v4, %v657_v7 }
  0x46   : > { %813 = vrot.lane.b32.xlu1 %v1862_v39, %s2067_s25  ;;  %v1871_v8 = vcombine.low %v2291_v42, %v658_v0 }
  0x47   : > { %797 = vrot.lane.b32.xlu0 %v1857_v38, %s2066_s24 }
  0x4a   : > { %815 = vrot.lane.b32.xlu1 %v1863_v50, %s2067_s25 }
  0x4b   : > { %809 = vrot.lane.b32.xlu0 %v1860_v48, %s2067_s25 }
  0x4e   : > { %827 = vrot.lane.b32.xlu1 %v1866_v54, %s2069_s11 }
  0x4f   : > { %811 = vrot.lane.b32.xlu0 %v1861_v53, %s2067_s25 }
  0x52   : > { %829 = vrot.lane.b32.xlu1 %v1867_v9, %s2069_s11 }
  0x53   : > { %823 = vrot.lane.b32.xlu0 %v1864_v6, %s2069_s11 }
  0x56   : > { %840 = vrot.lane.b32.xlu1 %v1870_v3, %s2070_s10 }
  0x57   : > { %825 = vrot.lane.b32.xlu0 %v1865_v10, %s2069_s11 }
  0x5a   : > { %842 = vrot.lane.b32.xlu1 %v1871_v8, %s2070_s10 }
  0x5b   : > { %836 = vrot.lane.b32.xlu0 %v1868_v5, %s2070_s10 }
  0x5f   : > { %838 = vrot.lane.b32.xlu0 %v1869_v1, %s2070_s10 }
  0x86   : > { %v702_v2 = vpop.permute.xlu1 %701 }
  0x87   : > { %v700_v11 = vpop.permute.xlu0 %699  ;;  %v850_v22 = vsel %vm844_vm6, %v1837_v29, %v702_v2  ;;  %v2071_v2 = vmov 0.0  }
  0x88   : > { %v847_v50 = vsel %vm844_vm6, %v1836_v28, %v700_v11  ;;  %1085 = vst [vmem:[#allocation2 + $0x30] sm:$0xff] %v2071_v2  ;;  %1086 = vst [vmem:[#allocation2 + $0x38] sm:$0x3] %v2071_v2  ;;  %v1872_v11 = vld [vmem:[%s2927_s5] ss:$0 sm:$0xff] }
  0x89   : > { %1080 = vst [vmem:[#allocation2 + $0x8] sm:$0x3] %v2071_v2  ;;  %1081 = vst [vmem:[#allocation2 + $0x10] sm:$0xff] %v2071_v2 }
  0x8a   : > { %v706_v30 = vpop.permute.xlu1 %705  ;;  %1082 = vst [vmem:[#allocation2 + $0x18] sm:$0x3] %v2071_v2  ;;  %1083 = vst [vmem:[#allocation2 + $0x20] sm:$0xff] %v2071_v2 }
  0x8b   : > { %v704_v16 = vpop.permute.xlu0 %703  ;;  %1084 = vst [vmem:[#allocation2 + $0x28] sm:$0x3] %v2071_v2  ;;  %1087 = vst [vmem:[#allocation2 + $0x40] sm:$0xff] %v2071_v2 }
  0x8c   : > { %v853_v41 = vsel %vm844_vm6, %v1838_v36, %v704_v16  ;;  %v856_v36 = vsel %vm844_vm6, %v1839_v35, %v706_v30  ;;  %1088 = vst [vmem:[#allocation2 + $0x48] sm:$0x3] %v2071_v2  ;;  %1089 = vst [vmem:[#allocation2 + $0x50] sm:$0xff] %v2071_v2 }
  0x8d   : > { %1090 = vst [vmem:[#allocation2 + $0x58] sm:$0x3] %v2071_v2  ;;  %1091 = vst [vmem:[#allocation2 + $0x60] sm:$0xff] %v2071_v2 }
  0x8e   : > { %v752_v61 = vpop.permute.xlu1 %751  ;;  %1092 = vst [vmem:[#allocation2 + $0x68] sm:$0x3] %v2071_v2  ;;  %1093 = vst [vmem:[#allocation2 + $0x70] sm:$0xff] %v2071_v2 }
  0x8f   : > { %v748_v13 = vpop.permute.xlu0 %747  ;;  %1094 = vst [vmem:[#allocation2 + $0x78] sm:$0x3] %v2071_v2  ;;  %1095 = vst [vmem:[#allocation2 + $0x80] sm:$0xff] %v2071_v2 }
  0x90   : > { %1096 = vst [vmem:[#allocation2 + $0x88] sm:$0x3] %v2071_v2  ;;  %1098 = vst [vmem:[#allocation2 + $0x98] sm:$0x3] %v2071_v2 }
  0x97   : > { %v724_v15 = vpop.permute.xlu1 %723 }
  0x98   : > { %v863_v48 = vsel %vm857_vm5, %v853_v41, %v724_v15 }
  0x99   : > { %v872_v33 = vsel %vm866_vm7, %v863_v48, %v752_v61 }
  0x9b   : > { %v720_v17 = vpop.permute.xlu0 %719 }
  0x9c   : > { %v859_v25 = vsel %vm857_vm5, %v847_v50, %v720_v17 }
  0x9d   : > { %v868_v53 = vsel %vm866_vm7, %v859_v25, %v748_v13  ;;  %v2464_v25 = vld [vmem:[%s2928_s6] sm:$0xff] }
  0xa0   : > { %v726_v18 = vpop.permute.xlu1 %725 }
  0xa1   : > { %v865_v40 = vsel %vm857_vm5, %v856_v36, %v726_v18 }
  0xa4   : > { %v754_v12 = vpop.permute.xlu1 %753 }
  0xa5   : > { %v722_v62 = vpop.permute.xlu0 %721  ;;  %v874_v28 = vsel %vm866_vm7, %v865_v40, %v754_v12 }
  0xa6   : > { %v861_v57 = vsel %vm857_vm5, %v850_v22, %v722_v62 }
  0xa8   : > { %v780_v51 = vpop.permute.xlu1 %779 }
  0xa9   : > { %v750_v56 = vpop.permute.xlu0 %749  ;;  %v881_v34 = vsel %vm875_vm8, %v872_v33, %v780_v51 }
  0xaa   : > { %v870_v6 = vsel %vm866_vm7, %v861_v57, %v750_v56 }
  0xac   : > { %v782_v20 = vpop.permute.xlu1 %781 }
  0xad   : > { %v776_v42 = vpop.permute.xlu0 %775  ;;  %v883_v14 = vsel %vm875_vm8, %v874_v28, %v782_v20 }
  0xae   : > { %v877_v60 = vsel %vm875_vm8, %v868_v53, %v776_v42 }
  0xb0   : > { %v800_v24 = vpop.permute.xlu1 %799 }
  0xb1   : > { %v778_v23 = vpop.permute.xlu0 %777  ;;  %v890_v52 = vsel %vm884_vm9, %v881_v34, %v800_v24 }
  0xb2   : > { %v879_v4 = vsel %vm875_vm8, %v870_v6, %v778_v23 }
  0xb4   : > { %v802_v19 = vpop.permute.xlu1 %801 }
  0xb5   : > { %v796_v32 = vpop.permute.xlu0 %795  ;;  %v892_v55 = vsel %vm884_vm9, %v883_v14, %v802_v19  ;;  %v1109_v14 = vld [vmem:[#allocation2 + $0x8] sm:$0x3] }
  0xb6   : > { %v886_v27 = vsel %vm884_vm9, %v877_v60, %v796_v32 }
  0xb8   : > { %v814_v31 = vpop.permute.xlu1 %813 }
  0xb9   : > { %v798_v63 = vpop.permute.xlu0 %797  ;;  %v899_v49 = vsel %vm893_vm10, %v890_v52, %v814_v31  ;;  %v1130_v31 = vlaneseq }
  0xba   : > { %v888_v3 = vsel %vm884_vm9, %v879_v4, %v798_v63 }
  0xbb   : > { %v2458_v50 = vshrl.u32 %v1130_v31, 7 }
  0xbc   : > { %v816_v39 = vpop.permute.xlu1 %815 }
  0xbd   : > { %v810_v38 = vpop.permute.xlu0 %809  ;;  %v901_v59 = vsel %vm893_vm10, %v892_v55, %v816_v39  ;;  %v1229_v60 = vsub.s32 2, %v2458_v50  ;;  %v1132_v55 = vsub.s32 0, %v2458_v50 }
  0xbe   : > { %v895_v58 = vsel %vm893_vm10, %v886_v27, %v810_v38 }
  0xc0   : > { %v828_v45 = vpop.permute.xlu1 %827 }
  0xc1   : > { %v812_v43 = vpop.permute.xlu0 %811  ;;  %v908_v54 = vsel %vm902_vm11, %v899_v49, %v828_v45 }
  0xc2   : > { %v897_v0 = vsel %vm893_vm10, %v888_v3, %v812_v43 }
  0xc4   : > { %v830_v26 = vpop.permute.xlu1 %829 }
  0xc5   : > { %v824_v46 = vpop.permute.xlu0 %823  ;;  %v910_v37 = vsel %vm902_vm11, %v901_v59, %v830_v26 }
  0xc6   : > { %v904_v9 = vsel %vm902_vm11, %v895_v58, %v824_v46  ;;  %v1152_v46 = vsub.s32 1, %v2458_v50 }
  0xc8   : > { %v841_v21 = vpop.permute.xlu1 %840  ;;  %v2467_v53 = vrot.slane %v2464_v25, %v1152_v46 }
  0xc9   : > { %v826_v47 = vpop.permute.xlu0 %825  ;;  %v917_v35 = vsel %vm911_vm12, %v908_v54, %v841_v21 }
  0xca   : > { %1937 = vmatprep.mubr.msk.bf16.mxu1 %vm942_vm13, %v917_v35  ;;  %v906_v5 = vsel %vm902_vm11, %v897_v0, %v826_v47  ;;  %v1154_v58 = vmul.f32 0.0, %v2467_v53  ;;  %v1155_v59 = vmul.f32 %v2467_v53, %v1109_v14 }
  0xcc   : > { %v843_v29 = vpop.permute.xlu1 %842  ;;  %v1188_v4 = vrot.slane %v1155_v59, 1 }
  0xcd   : > { %v837_v44 = vpop.permute.xlu0 %836  ;;  %v919_v10 = vsel %vm911_vm12, %v910_v37, %v843_v29  ;;  %v1497_v37 = vsub.s32 7, %v2458_v50  ;;  %v1187_v29 = vrot.slane %v1154_v58, 1 }
  0xce   : > { %v913_v7 = vsel %vm911_vm12, %v904_v9, %v837_v44  ;;  %1938 = vmatmul.mubr.msk.bf16.vlgmr.msra.gmra.mrb[0].mxu1 %vm942_vm13, %v919_v10  ;;  %v2474_v9 = vrot.slane %v2464_v25, %v1229_v60  ;;  %v2478_v44 = vrot.slane %v2464_v25, %v1132_v55 }
  0xcf   : > { %1933 = vmatprep.mubr.msk.bf16.mxu0 %vm942_vm13, %v913_v7 }
  0xd0   : > { %v1231_v10 = vmul.f32 0.0, %v2474_v9  ;;  %v1232_v3 = vmul.f32 %v2474_v9, %v1109_v14 }
  0xd1   : > { %v839_v8 = vpop.permute.xlu0 %838 }
  0xd2   : > { %v915_v1 = vsel %vm911_vm12, %v906_v5, %v839_v8 }
  0xd3   : > { %1934 = vmatmul.mubr.msk.bf16.vlgmr.msra.gmra.mrb[0].mxu0 %vm942_vm13, %v915_v1  ;;  %v2484_v1 = vrot.slane %v2464_v25, %v1497_v37 }
 0x1a1   : > { %v1939_v30 = vpop.f32.mrb[0].mxu1 }
 0x1a2   : > { %v2434_v16 = vadd.f32 %v1939_v30, %v1872_v11  ;;  %v1008_v61 = vpop.f32.mrb[1].mxu1 }
 0x1a3   : > { %v2436_v13 = vadd.f32 %v1872_v11, %v1008_v61  ;;  %v1940_v15 = vpop.f32.mrb[2].mxu1  ;;  %v1134_v61 = vmul.f32 0.0, %v2478_v44 }
 0x1a4   : > { %v1885_v17 = vmul.f32 -1.442695, %v2434_v16  ;;  %v2439_v18 = vadd.f32 %v1940_v15, %v1872_v11  ;;  %v1011_v62 = vpop.f32.mrb[3].mxu1  ;;  %v1189_v15 = vsel %vm1186_vm14, %v1187_v29, %v1188_v4 }
 0x1a5   : > { %v1883_v56 = vmul.f32 -1.442695, %v2436_v13  ;;  %v2442_v51 = vadd.f32 %v1872_v11, %v1011_v62 }
 0x1a6   : > { %v1935_v12 = vpop.f32.mrb[0].mxu0  ;;  %1990 = vpow2.f32 %v1885_v17  ;;  %v1886_v23 = vmul.f32 -1.442695, %v2439_v18 }
 0x1a7   : > { %v2444_v42 = vadd.f32 %v1935_v12, %v1872_v11  ;;  %v992_v20 = vpop.f32.mrb[1].mxu0  ;;  %1992 = vpow2.f32 %v1883_v56  ;;  %v1884_v19 = vmul.f32 -1.442695, %v2442_v51  ;;  %v1263_v12 = vrot.slane %v1231_v10, 2 }
 0x1a8   : > { %v2447_v24 = vadd.f32 %v1872_v11, %v992_v20  ;;  %v1936_v32 = vpop.f32.mrb[2].mxu0  ;;  %1994 = vpow2.f32 %v1886_v23  ;;  %v1264_v56 = vrot.slane %v1232_v3, 2 }
 0x1a9   : > { %v1881_v63 = vmul.f32 -1.442695, %v2444_v42  ;;  %v2451_v38 = vadd.f32 %v1936_v32, %v1872_v11  ;;  %v995_v39 = vpop.f32.mrb[3].mxu0  ;;  %1996 = vpow2.f32 %v1884_v19 }
 0x1aa   : > { %v1879_v41 = vmul.f32 -1.442695, %v2447_v24  ;;  %v2454_v43 = vadd.f32 %v1872_v11, %v995_v39  ;;  %v1127_v11 = vld [vmem:[#allocation2 + $0x98] sm:$0x3]  ;;  %v1325_v39 = vsub.s32 4, %v2458_v50  ;;  %v1265_v46 = vsel %vm952_vm4, %v1263_v12, %v1264_v56 }
 0x1ab   : > { %1998 = vpow2.f32 %v1881_v63  ;;  %v1882_v45 = vmul.f32 -1.442695, %v2451_v38  ;;  %v1514_v19 = vmul.f32 %v2484_v1, %v1127_v11 }
 0x1ac   : > { %2000 = vpow2.f32 %v1879_v41  ;;  %v1880_v48 = vmul.f32 -1.442695, %v2454_v43  ;;  %v1401_v41 = vsub.s32 5, %v2458_v50 }
 0x1ad   : > { %2002 = vpow2.f32 %v1882_v45 }
 0x1ae   : > { %2004 = vpow2.f32 %v1880_v48  ;;  %v1477_v48 = vsub.s32 6, %v2458_v50 }
 0x1b0   : > { %v1991_v33 = vpop.eup %1990 }
 0x1b1   : > { %v1993_v26 = vpop.eup %1992  ;;  %v1053_v34 = vadd.f32 1.0, %v1991_v33  ;;  %v1219_v33 = vadd.f32 %v1189_v15, %v1134_v61 }
 0x1b2   : > { %v1995_v36 = vpop.eup %1994  ;;  %v1051_v52 = vadd.f32 1.0, %v1993_v26  ;;  %v1305_v26 = vsub.s32 3, %v2458_v50 }
 0x1b3   : > { %v1997_v40 = vpop.eup %1996  ;;  %2006 = vrcp.f32 %v1053_v34  ;;  %v1054_v49 = vadd.f32 1.0, %v1995_v36 }
 0x1b4   : > { %2008 = vrcp.f32 %v1051_v52  ;;  %v1052_v54 = vadd.f32 1.0, %v1997_v40  ;;  %v1553_v52 = vrot.slane %v1514_v19, 1  ;;  %v2525_v50 = vrot.slane %v2464_v25, %v1305_v26 }
 0x1b5   : > { %v1999_v28 = vpop.eup %1998  ;;  %2010 = vrcp.f32 %v1054_v49  ;;  %v2510_v49 = vrot.slane %v2464_v25, %v1325_v39 }
 0x1b6   : > { %v2001_v47 = vpop.eup %2000  ;;  %v1049_v21 = vadd.f32 1.0, %v1999_v28  ;;  %2012 = vrcp.f32 %v1052_v54  ;;  %v2513_v28 = vrot.slane %v2464_v25, %v1401_v41 }
 0x1b7   : > { %v2003_v35 = vpop.eup %2002  ;;  %v1047_v22 = vadd.f32 1.0, %v2001_v47  ;;  %v2520_v47 = vrot.slane %v2464_v25, %v1477_v48 }
 0x1b8   : > { %v2005_v27 = vpop.eup %2004  ;;  %2014 = vrcp.f32 %v1049_v21  ;;  %v1050_v57 = vadd.f32 1.0, %v2003_v35 }
 0x1b9   : > { %2016 = vrcp.f32 %v1047_v22  ;;  %v1048_v6 = vadd.f32 1.0, %v2005_v27  ;;  %v2528_v21 = vmul.f32 0.0, %v2520_v47 }
 0x1ba   : > { %2018 = vrcp.f32 %v1050_v57 }
 0x1bb   : > { %2020 = vrcp.f32 %v1048_v6 }
 0x1bd   : > { %v2007_v7 = vpop.eup %2006 }
 0x1be   : > { %v2009_v0 = vpop.eup %2008  ;;  %v1077_v5 = vmul.f32 %v2007_v7, %v2434_v16  ;;  %v2493_v16 = vld [vmem:[%s2928_s6 + $0x8] ss:$0 sm:$0xff] }
 0x1bf   : > { %v2011_v8 = vpop.eup %2010  ;;  %v1075_v2 = vmul.f32 %v2009_v0, %v2436_v13  ;;  %v1513_v13 = vmul.f32 0.0, %v2484_v1  ;;  %v1590_v63 = vmul.f32 %v2493_v16, %v1127_v11 }
 0x1c0   : > { %v2013_v30 = vpop.eup %2012  ;;  %1106 = vst [vmem:[#allocation2 + $0x71] sm:$0xff] %v1077_v5  ;;  %v1078_v17 = vmul.f32 %v2011_v8, %v2439_v18  ;;  %v1589_v18 = vmul.f32 0.0, %v2493_v16 }
 0x1c1   : > { %1104 = vst [vmem:[#allocation2 + $0x51] sm:$0xff] %v1075_v2  ;;  %v1076_v20 = vmul.f32 %v2013_v30, %v2442_v51  ;;  %v1552_v36 = vrot.slane %v1513_v13, 1 }
 0x1c2   : > { %v2015_v62 = vpop.eup %2014  ;;  %1107 = vst [vmem:[#allocation2 + $0x81] sm:$0xff] %v1078_v17  ;;  %v1628_v40 = vrot.slane %v1589_v18, 2 }
 0x1c3   : > { %v2017_v23 = vpop.eup %2016  ;;  %v1073_v32 = vmul.f32 %v2015_v62, %v2444_v42  ;;  %1105 = vst [vmem:[#allocation2 + $0x61] sm:$0xff] %v1076_v20  ;;  %v2535_v35 = vsel %vm1186_vm14, %v1552_v36, %v1553_v52 }
 0x1c4   : > { %v2019_v31 = vpop.eup %2018  ;;  %v1071_v45 = vmul.f32 %v2017_v23, %v2447_v24  ;;  %v1629_v24 = vrot.slane %v1590_v63, 2 }
 0x1c5   : > { %v2021_v51 = vpop.eup %2020  ;;  %1102 = vst [vmem:[#allocation2 + $0x31] sm:$0xff] %v1073_v32  ;;  %v1074_v42 = vmul.f32 %v2019_v31, %v2451_v38 }
 0x1c6   : > { %1100 = vst [vmem:[#allocation2 + $0x11] sm:$0xff] %v1071_v45  ;;  %v1072_v34 = vmul.f32 %v2021_v51, %v2454_v43  ;;  %v2522_v43 = vadd.f32 %v1265_v46, %v1219_v33  ;;  %v2538_v22 = vsel %vm952_vm4, %v1628_v40, %v1629_v24 }
 0x1c7   : > { %1103 = vst [vmem:[#allocation2 + $0x41] sm:$0xff] %v1074_v42  ;;  %v2515_v38 = vld [vmem:[#allocation2 + $0x70] sm:$0xff]  ;;  %v2517_v54 = vld [vmem:[#allocation2 + $0x78] sm:$0x3] }
 0x1c8   : > { %1101 = vst [vmem:[#allocation2 + $0x21] sm:$0xff] %v1072_v34  ;;  %v1168_v60 = vmul.f32 %v2467_v53, %v2515_v38  ;;  %v1169_v14 = vmul.f32 %v2467_v53, %v2517_v54  ;;  %v2544_v25 = vmul.f32 %v2474_v9, %v2517_v54  ;;  %v1339_v57 = vmul.f32 %v2510_v49, %v2515_v38 }
 0x1c9   : > { %v1340_v58 = vmul.f32 %v2510_v49, %v2517_v54  ;;  %v1415_v59 = vmul.f32 %v2513_v28, %v2515_v38  ;;  %v1416_v4 = vmul.f32 %v2513_v28, %v2517_v54  ;;  %v2583_v34 = vmul.f32 %v2484_v1, %v2515_v38 }
 0x1ca   : > { %v1208_v11 = vrot.slane %v1168_v60, 1  ;;  %v1209_v18 = vrot.slane %v1169_v14, 1  ;;  %v1377_v63 = vrot.slane %v1339_v57, 1  ;;  %v1285_v26 = vrot.slane %v2544_v25, 2 }
 0x1cb   : > { %v1378_v31 = vrot.slane %v1340_v58, 1  ;;  %v1453_v39 = vrot.slane %v1415_v59, 2  ;;  %v1454_v51 = vrot.slane %v1416_v4, 2  ;;  %v2587_v36 = vmul.f32 %v2484_v1, %v2517_v54 }
 0x1cc   : > { %v2540_v27 = vld [vmem:[#allocation2 + $0x30] sm:$0xff]  ;;  %v1115_v55 = vld [vmem:[#allocation2 + $0x38] sm:$0x3]  ;;  %v2599_v14 = vsel %vm1186_vm14, %v1208_v11, %v1209_v18 }
 0x1cd   : > { %v1160_v6 = vmul.f32 %v2467_v53, %v2540_v27  ;;  %v1161_v37 = vmul.f32 %v2467_v53, %v1115_v55  ;;  %v1237_v29 = vmul.f32 %v2474_v9, %v2540_v27  ;;  %v1238_v7 = vmul.f32 %v2474_v9, %v1115_v55  ;;  %v1110_v42 = vld [vmem:[#allocation2 + $0x10] sm:$0xff]  ;;  %v1111_v33 = vld [vmem:[#allocation2 + $0x18] sm:$0x3] }
 0x1ce   : > { %v1331_v10 = vmul.f32 %v2510_v49, %v2540_v27  ;;  %v1332_v3 = vmul.f32 %v2510_v49, %v1115_v55  ;;  %v1407_v0 = vmul.f32 %v2513_v28, %v2540_v27  ;;  %v1408_v2 = vmul.f32 %v2513_v28, %v1115_v55  ;;  %v2620_v11 = vld [vmem:[#allocation2 + $0x50] sm:$0xff] }
 0x1cf   : > { %v1196_v5 = vrot.slane %v1160_v6, 1  ;;  %v1197_v8 = vrot.slane %v1161_v37, 1  ;;  %v1137_v30 = vmul.f32 %v2478_v44, %v2540_v27  ;;  %v1272_v61 = vrot.slane %v1237_v29, 2 }
 0x1d0   : > { %v1273_v15 = vrot.slane %v1238_v7, 2  ;;  %v1365_v17 = vrot.slane %v1331_v10, 1  ;;  %v1366_v12 = vrot.slane %v1332_v3, 1  ;;  %v1501_v56 = vmul.f32 %v2484_v1, %v2540_v27 }
 0x1d1   : > { %v1198_v62 = vsel %vm1186_vm14, %v1196_v5, %v1197_v8  ;;  %v1502_v13 = vmul.f32 %v2484_v1, %v1115_v55  ;;  %v1441_v23 = vrot.slane %v1407_v0, 2  ;;  %v1442_v32 = vrot.slane %v1408_v2, 2 }
 0x1d2   : > { %v1222_v20 = vadd.f32 %v1198_v62, %v1137_v30  ;;  %v2574_v19 = vmul.f32 %v2493_v16, %v2540_v27  ;;  %v1534_v41 = vrot.slane %v1501_v56, 1  ;;  %v2577_v48 = vmul.f32 %v2493_v16, %v1115_v55  ;;  %v1119_v62 = vld [vmem:[#allocation2 + $0x58] sm:$0x3] }
 0x1d3   : > { %v1535_v45 = vrot.slane %v1502_v13, 1  ;;  %v1274_v46 = vsel %vm952_vm4, %v1272_v61, %v1273_v15  ;;  %v2592_v40 = vsel %vm1186_vm14, %v1365_v17, %v1366_v12  ;;  %v2595_v24 = vsel %vm952_vm4, %v1441_v23, %v1442_v32 }
 0x1d4   : > { %v2589_v52 = vadd.f32 %v1274_v46, %v1222_v20  ;;  %v1610_v60 = vrot.slane %v2574_v19, 2  ;;  %v2602_v55 = vsel %vm1186_vm14, %v1377_v63, %v1378_v31  ;;  %v1156_v57 = vmul.f32 %v2467_v53, %v1110_v42 }
 0x1d5   : > { %v1157_v58 = vmul.f32 %v2467_v53, %v1111_v33  ;;  %v2607_v59 = vsel %vm1186_vm14, %v1534_v41, %v1535_v45  ;;  %v1611_v6 = vrot.slane %v2577_v48, 2  ;;  %v2611_v37 = vsel %vm952_vm4, %v1453_v39, %v1454_v51 }
 0x1d6   : > { %v1233_v29 = vmul.f32 %v2474_v9, %v1110_v42  ;;  %v1190_v4 = vrot.slane %v1156_v57, 1  ;;  %v1234_v10 = vmul.f32 %v2474_v9, %v1111_v33  ;;  %v1307_v3 = vmul.f32 %v2525_v50, %v1110_v42 }
 0x1d7   : > { %v1191_v7 = vrot.slane %v1157_v58, 1  ;;  %v1547_v5 = vrot.slane %v2587_v36, 1  ;;  %v1327_v8 = vmul.f32 %v2510_v49, %v1110_v42  ;;  %v1328_v2 = vmul.f32 %v2510_v49, %v1111_v33 }
 0x1d8   : > { %v2624_v30 = vmul.f32 %v2493_v16, %v2515_v38  ;;  %v1403_v15 = vmul.f32 %v2513_v28, %v1110_v42  ;;  %v1404_v17 = vmul.f32 %v2513_v28, %v1111_v33  ;;  %v1135_v12 = vmul.f32 %v2478_v44, %v1110_v42 }
 0x1d9   : > { %v1192_v61 = vsel %vm1186_vm14, %v1190_v4, %v1191_v7  ;;  %v1315_v56 = vadd.f32 %v1307_v3, %v2522_v43  ;;  %v1359_v13 = vrot.slane %v1327_v8, 1  ;;  %v1360_v20 = vrot.slane %v1328_v2, 1 }
 0x1da   : > { %v2633_v23 = vmul.f32 %v2493_v16, %v2517_v54  ;;  %v1266_v32 = vrot.slane %v1233_v29, 2  ;;  %v1267_v19 = vrot.slane %v1234_v10, 2  ;;  %v1164_v18 = vmul.f32 %v2467_v53, %v2620_v11 }
 0x1db   : > { %v1220_v63 = vadd.f32 %v1192_v61, %v1135_v12  ;;  %v1361_v31 = vsel %vm1186_vm14, %v1359_v13, %v1360_v20  ;;  %v1165_v39 = vmul.f32 %v2467_v53, %v1119_v62  ;;  %v1241_v41 = vmul.f32 %v2474_v9, %v2620_v11  ;;  %v2664_v12 = vld [vmem:[#allocation2 + $0x40] sm:$0xff] }
 0x1dc   : > { %v1435_v43 = vrot.slane %v1403_v15, 2  ;;  %v1436_v45 = vrot.slane %v1404_v17, 2  ;;  %v1202_v48 = vrot.slane %v1164_v18, 1  ;;  %v1242_v51 = vmul.f32 %v2474_v9, %v1119_v62 }
 0x1dd   : > { %v1391_v54 = vadd.f32 %v1361_v31, %v1315_v56  ;;  %v1203_v42 = vrot.slane %v1165_v39, 1  ;;  %v1335_v33 = vmul.f32 %v2510_v49, %v2620_v11  ;;  %v1336_v46 = vmul.f32 %v2510_v49, %v1119_v62  ;;  %v1117_v56 = vld [vmem:[#allocation2 + $0x48] sm:$0x3] }
 0x1de   : > { %v1278_v57 = vrot.slane %v1241_v41, 2  ;;  %v1279_v58 = vrot.slane %v1242_v51, 2  ;;  %v2647_v29 = vmul.f32 %v2513_v28, %v2620_v11  ;;  %v2650_v4 = vmul.f32 %v2513_v28, %v1119_v62 }
 0x1df   : > { %v1139_v7 = vmul.f32 %v2478_v44, %v2620_v11  ;;  %v1204_v10 = vsel %vm1186_vm14, %v1202_v48, %v1203_v42  ;;  %v1371_v3 = vrot.slane %v1335_v33, 1  ;;  %v1372_v8 = vrot.slane %v1336_v46, 1 }
 0x1e0   : > { %v2656_v2 = vsel %vm952_vm4, %v1610_v60, %v1611_v6  ;;  %v1268_v15 = vsel %vm952_vm4, %v1266_v32, %v1267_v19  ;;  %v2662_v17 = vmul.f32 %v2484_v1, %v2620_v11  ;;  %v1437_v18 = vsel %vm952_vm4, %v1435_v43, %v1436_v45 }
 0x1e1   : > { %v2667_v20 = vadd.f32 %v1268_v15, %v1220_v63  ;;  %v1224_v31 = vadd.f32 %v1204_v10, %v1139_v7  ;;  %v2670_v60 = vadd.f32 %v1437_v18, %v1391_v54  ;;  %v1280_v6 = vsel %vm952_vm4, %v1278_v57, %v1279_v58 }
 0x1e2   : > { %v1447_v32 = vrot.slane %v2647_v29, 2  ;;  %v1448_v19 = vrot.slane %v2650_v4, 2  ;;  %v2676_v39 = vsel %vm1186_vm14, %v1371_v3, %v1372_v8  ;;  %v1506_v41 = vmul.f32 %v2484_v1, %v1119_v62 }
 0x1e3   : > { %v1162_v63 = vmul.f32 %v2467_v53, %v2664_v12  ;;  %v1163_v48 = vmul.f32 %v2467_v53, %v1117_v56  ;;  %v1540_v43 = vrot.slane %v2662_v17, 1  ;;  %v1581_v45 = vmul.f32 %v2493_v16, %v2620_v11 }
 0x1e4   : > { %v1239_v51 = vmul.f32 %v2474_v9, %v2664_v12  ;;  %v1240_v54 = vmul.f32 %v2474_v9, %v1117_v56  ;;  %v2688_v42 = vadd.f32 %v1280_v6, %v1224_v31  ;;  %v1582_v33 = vmul.f32 %v2493_v16, %v1119_v62 }
 0x1e5   : > { %v1199_v46 = vrot.slane %v1162_v63, 1  ;;  %v1200_v57 = vrot.slane %v1163_v48, 1  ;;  %v1138_v58 = vmul.f32 %v2478_v44, %v2664_v12  ;;  %v1310_v7 = vmul.f32 %v2525_v50, %v2664_v12 }
 0x1e6   : > { %v1275_v29 = vrot.slane %v1239_v51, 2  ;;  %v1276_v4 = vrot.slane %v1240_v54, 2  ;;  %v1333_v3 = vmul.f32 %v2510_v49, %v2664_v12  ;;  %v1334_v8 = vmul.f32 %v2510_v49, %v1117_v56 }
 0x1e7   : > { %v1201_v10 = vsel %vm1186_vm14, %v1199_v46, %v1200_v57  ;;  %v1409_v62 = vmul.f32 %v2513_v28, %v2664_v12  ;;  %v1541_v15 = vrot.slane %v1506_v41, 1  ;;  %v1318_v18 = vadd.f32 %v1310_v7, %v2589_v52 }
 0x1e8   : > { %v1223_v17 = vadd.f32 %v1201_v10, %v1138_v58  ;;  %v1410_v31 = vmul.f32 %v2513_v28, %v1117_v56  ;;  %v1277_v6 = vsel %vm952_vm4, %v1275_v29, %v1276_v4  ;;  %v1368_v63 = vrot.slane %v1333_v3, 1 }
 0x1e9   : > { %v1369_v48 = vrot.slane %v1334_v8, 1  ;;  %v1444_v51 = vrot.slane %v1409_v62, 2  ;;  %v1503_v57 = vmul.f32 %v2484_v1, %v2664_v12  ;;  %v1504_v61 = vmul.f32 %v2484_v1, %v1117_v56  ;;  %v1124_v8 = vld [vmem:[#allocation2 + $0x80] sm:$0xff]  ;;  %v1125_v62 = vld [vmem:[#allocation2 + $0x88] sm:$0x3] }
 0x1ea   : > { %v1299_v54 = vadd.f32 %v1277_v6, %v1223_v17  ;;  %v1445_v46 = vrot.slane %v1410_v31, 2  ;;  %v1311_v41 = vmul.f32 %v2525_v50, %v2620_v11  ;;  %v1579_v52 = vmul.f32 %v2493_v16, %v2664_v12 }
 0x1eb   : > { %v1370_v58 = vsel %vm1186_vm14, %v1368_v63, %v1369_v48  ;;  %v1580_v29 = vmul.f32 %v2493_v16, %v1117_v56  ;;  %v1616_v4 = vrot.slane %v1581_v45, 2  ;;  %v1617_v7 = vrot.slane %v1582_v33, 2 }
 0x1ec   : > { %v1394_v10 = vadd.f32 %v1370_v58, %v1318_v18  ;;  %v1482_v3 = vmul.f32 %v2520_v47, %v2620_v11  ;;  %v1319_v17 = vadd.f32 %v1311_v41, %v1299_v54  ;;  %v1446_v31 = vsel %vm952_vm4, %v1444_v51, %v1445_v46 }
 0x1ed   : > { %v1537_v6 = vrot.slane %v1503_v57, 1  ;;  %v1141_v63 = vmul.f32 %v2478_v44, %v2515_v38  ;;  %v1538_v13 = vrot.slane %v1504_v61, 1  ;;  %v1613_v0 = vrot.slane %v1579_v52, 2 }
 0x1ee   : > { %v1470_v48 = vadd.f32 %v1446_v31, %v1394_v10  ;;  %v1245_v56 = vmul.f32 %v2474_v9, %v2515_v38  ;;  %v1614_v45 = vrot.slane %v1580_v29, 2  ;;  %v1341_v11 = vmul.f32 %v2510_v49, %v1124_v8  ;;  %v2736_v31 = vld [vmem:[#allocation2 + $0x20] sm:$0xff] }
 0x1ef   : > { %v1226_v33 = vadd.f32 %v2599_v14, %v1141_v63  ;;  %v1342_v18 = vmul.f32 %v2510_v49, %v1125_v62  ;;  %v1417_v51 = vmul.f32 %v2513_v28, %v1124_v8  ;;  %v1418_v46 = vmul.f32 %v2513_v28, %v1125_v62 }
 0x1f0   : > { %v1490_v54 = vadd.f32 %v1482_v3, %v1470_v48  ;;  %v1284_v41 = vrot.slane %v1245_v56, 2  ;;  %v2726_v57 = vsel %vm952_vm4, %v1447_v32, %v1448_v19  ;;  %v1542_v61 = vsel %vm1186_vm14, %v1540_v43, %v1541_v15  ;;  %v1113_v43 = vld [vmem:[#allocation2 + $0x28] sm:$0x3] }
 0x1f1   : > { %v1380_v58 = vrot.slane %v1341_v11, 1  ;;  %v1381_v52 = vrot.slane %v1342_v18, 1  ;;  %v1618_v29 = vsel %vm952_vm4, %v1616_v4, %v1617_v7  ;;  %v2734_v3 = vmul.f32 %v2484_v1, %v1124_v8 }
 0x1f2   : > { %v1566_v14 = vadd.f32 %v1542_v61, %v1490_v54  ;;  %v1286_v10 = vsel %vm952_vm4, %v1284_v41, %v1285_v26  ;;  %v1314_v32 = vmul.f32 %v2525_v50, %v1124_v8  ;;  %v1456_v19 = vrot.slane %v1417_v51, 2  ;;  %v2776_v61 = vld [vmem:[%s2929_s7] ss:$0 sm:$0xff] }
 0x1f3   : > { %v1302_v63 = vadd.f32 %v1286_v10, %v1226_v33  ;;  %v1457_v48 = vrot.slane %v1418_v46, 2  ;;  %v2740_v15 = vadd.f32 %v2676_v39, %v1319_v17  ;;  %v2744_v4 = vmul.f32 %v2520_v47, %v2664_v12 }
 0x1f4   : > { %v2747_v25 = vsel %vm1186_vm14, %v1537_v6, %v1538_v13  ;;  %v2750_v26 = vsel %vm952_vm4, %v1613_v0, %v1614_v45  ;;  %v1382_v56 = vsel %vm1186_vm14, %v1380_v58, %v1381_v52  ;;  %v2754_v33 = vmul.f32 %v2520_v47, %v1124_v8 }
 0x1f5   : > { %v1322_v7 = vadd.f32 %v1314_v32, %v1302_v63  ;;  %v1158_v39 = vmul.f32 %v2467_v53, %v2736_v31  ;;  %v1642_v17 = vadd.f32 %v1618_v29, %v1566_v14  ;;  %v2759_v11 = vmul.f32 %v2484_v1, %v1125_v62 }
 0x1f6   : > { %v1549_v12 = vrot.slane %v2734_v3, 1  ;;  %v1159_v13 = vmul.f32 %v2467_v53, %v1113_v43  ;;  %v1458_v0 = vsel %vm952_vm4, %v1456_v19, %v1457_v48  ;;  %v1235_v18 = vmul.f32 %v2474_v9, %v2736_v31 }
 0x1f7   : > { %v1398_v6 = vadd.f32 %v1382_v56, %v1322_v7  ;;  %v1193_v45 = vrot.slane %v1158_v39, 1  ;;  %v2767_v54 = vmul.f32 %v2493_v16, %v1124_v8  ;;  %v2770_v41 = vmul.f32 %v2493_v16, %v1125_v62 }
 0x1f8   : > { %v1194_v51 = vrot.slane %v1159_v13, 1  ;;  %v1236_v46 = vmul.f32 %v2474_v9, %v1113_v43  ;;  %v1136_v52 = vmul.f32 %v2478_v44, %v2736_v31  ;;  %v1269_v29 = vrot.slane %v1235_v18, 2 }
 0x1f9   : > { %v1474_v58 = vadd.f32 %v1458_v0, %v1398_v6  ;;  %v1308_v8 = vmul.f32 %v2525_v50, %v2736_v31  ;;  %v2783_v14 = vadd.f32 %v2776_v61, %v1642_v17  ;;  %v1329_v63 = vmul.f32 %v2510_v49, %v2736_v31 }
 0x1fa   : > { %v1195_v62 = vsel %vm1186_vm14, %v1193_v45, %v1194_v51  ;;  %v1270_v10 = vrot.slane %v1236_v46, 2  ;;  %v1330_v7 = vmul.f32 %v2510_v49, %v1113_v43  ;;  %v1405_v17 = vmul.f32 %v2513_v28, %v2736_v31 }
 0x1fb   : > { %v1494_v32 = vadd.f32 %v2528_v21, %v1474_v58  ;;  %v1221_v19 = vadd.f32 %v1195_v62, %v1136_v52  ;;  %v1316_v48 = vadd.f32 %v1308_v8, %v2667_v20  ;;  %v1362_v39 = vrot.slane %v1329_v63, 1  ;;  %v2805_v8 = vld [vmem:[#allocation2 + $0x60] sm:$0xff] }
 0x1fc   : > { %v1271_v56 = vsel %vm952_vm4, %v1269_v29, %v1270_v10  ;;  %v1406_v13 = vmul.f32 %v2513_v28, %v1113_v43  ;;  %v1309_v45 = vmul.f32 %v2525_v50, %v2540_v27  ;;  %v1363_v21 = vrot.slane %v1330_v7, 1 }
 0x1fd   : > { %v1570_v6 = vadd.f32 %v2535_v35, %v1494_v32  ;;  %v1297_v0 = vadd.f32 %v1271_v56, %v1221_v19  ;;  %v1438_v18 = vrot.slane %v1405_v17, 2  ;;  %v1479_v20 = vmul.f32 %v2520_v47, %v2736_v31  ;;  %v2814_v17 = vld [vmem:[#allocation2 + $0x68] sm:$0x3] }
 0x1fe   : > { %v1439_v51 = vrot.slane %v1406_v13, 2  ;;  %v1499_v46 = vmul.f32 %v2484_v1, %v2736_v31  ;;  %v1892_v58 = vmul.f32 -1.442695, %v2783_v14  ;;  %v1364_v35 = vsel %vm1186_vm14, %v1362_v39, %v1363_v21 }
 0x1ff   : > { %v1646_v52 = vadd.f32 %v2538_v22, %v1570_v6  ;;  %v1317_v29 = vadd.f32 %v1309_v45, %v1297_v0  ;;  %v1392_v62 = vadd.f32 %v1364_v35, %v1316_v48  ;;  %v1487_v10 = vadd.f32 %v1479_v20, %v2670_v60 }
 0x200   : > { %v1500_v63 = vmul.f32 %v2484_v1, %v1113_v43  ;;  %v1531_v32 = vrot.slane %v1499_v46, 1  ;;  %v1440_v7 = vsel %vm952_vm4, %v1438_v18, %v1439_v51  ;;  %v1575_v56 = vmul.f32 %v2493_v16, %v2736_v31 }
 0x201   : > { %v1393_v19 = vadd.f32 %v2592_v40, %v1317_v29  ;;  %v1576_v22 = vmul.f32 %v2493_v16, %v1113_v43  ;;  %v1468_v39 = vadd.f32 %v1440_v7, %v1392_v62  ;;  %v1480_v48 = vmul.f32 %v2520_v47, %v2540_v27 }
 0x202   : > { %v1532_v13 = vrot.slane %v1500_v63, 1  ;;  %v1166_v60 = vmul.f32 %v2467_v53, %v2805_v8  ;;  %v1550_v6 = vrot.slane %v2759_v11, 1  ;;  %v1607_v0 = vrot.slane %v1575_v56, 2 }
 0x203   : > { %v1469_v40 = vadd.f32 %v2595_v24, %v1393_v19  ;;  %v1608_v45 = vrot.slane %v1576_v22, 2  ;;  %v1488_v21 = vadd.f32 %v1480_v48, %v1468_v39  ;;  %v1167_v43 = vmul.f32 %v2467_v53, %v2814_v17 }
 0x204   : > { %v1533_v31 = vsel %vm1186_vm14, %v1531_v32, %v1532_v13  ;;  %v1205_v18 = vrot.slane %v1166_v60, 1  ;;  %2022 = vpow2.f32 %v1892_v58  ;;  %v2826_v27 = vadd.f32 %v2776_v61, %v1646_v52 }
 0x205   : > { %v1489_v51 = vadd.f32 %v2744_v4, %v1469_v40  ;;  %v1563_v20 = vadd.f32 %v1533_v31, %v1487_v10  ;;  %v1564_v46 = vadd.f32 %v2607_v59, %v1488_v21  ;;  %v1609_v24 = vsel %vm952_vm4, %v1607_v0, %v1608_v45 }
 0x206   : > { %v1206_v29 = vrot.slane %v1167_v43, 1  ;;  %v1243_v35 = vmul.f32 %v2474_v9, %v2805_v8  ;;  %v1140_v53 = vmul.f32 %v2478_v44, %v2805_v8  ;;  %v1244_v58 = vmul.f32 %v2474_v9, %v2814_v17 }
 0x207   : > { %v1565_v62 = vadd.f32 %v2747_v25, %v1489_v51  ;;  %v1639_v63 = vadd.f32 %v1609_v24, %v1563_v20  ;;  %v1640_v4 = vadd.f32 %v2656_v2, %v1564_v46  ;;  %v1312_v10 = vmul.f32 %v2525_v50, %v2805_v8 }
 0x208   : > { %v1207_v52 = vsel %vm1186_vm14, %v1205_v18, %v1206_v29  ;;  %v1281_v59 = vrot.slane %v1243_v35, 2  ;;  %v1282_v7 = vrot.slane %v1244_v58, 2  ;;  %v1313_v9 = vmul.f32 %v2525_v50, %v2515_v38 }
 0x209   : > { %v1641_v32 = vadd.f32 %v2750_v26, %v1565_v62  ;;  %v2844_v19 = vadd.f32 %v2776_v61, %v1639_v63  ;;  %v1225_v25 = vadd.f32 %v1207_v52, %v1140_v53  ;;  %v2847_v44 = vadd.f32 %v2776_v61, %v1640_v4 }
 0x20a   : > { %v1320_v2 = vadd.f32 %v1312_v10, %v2688_v42  ;;  %v1337_v56 = vmul.f32 %v2510_v49, %v2805_v8  ;;  %v1283_v39 = vsel %vm952_vm4, %v1281_v59, %v1282_v7  ;;  %v1338_v48 = vmul.f32 %v2510_v49, %v2814_v17 }
 0x20b   : > { %v2855_v22 = vadd.f32 %v2776_v61, %v1641_v32  ;;  %v1889_v26 = vmul.f32 -1.442695, %v2844_v19  ;;  %v1890_v13 = vmul.f32 -1.442695, %v2847_v44  ;;  %v1301_v60 = vadd.f32 %v1283_v39, %v1225_v25 }
 0x20c   : > { %v1374_v40 = vrot.slane %v1337_v56, 1  ;;  %v1413_v50 = vmul.f32 %v2513_v28, %v2805_v8  ;;  %v1375_v0 = vrot.slane %v1338_v48, 1  ;;  %v1414_v45 = vmul.f32 %v2513_v28, %v2814_v17 }
 0x20d   : > { %2024 = vpow2.f32 %v1889_v26  ;;  %v1891_v42 = vmul.f32 -1.442695, %v2855_v22  ;;  %v1321_v21 = vadd.f32 %v1313_v9, %v1301_v60  ;;  %v1471_v49 = vadd.f32 %v2726_v57, %v2740_v15 }
 0x20e   : > { %2026 = vpow2.f32 %v1890_v13  ;;  %v1450_v31 = vrot.slane %v1413_v50, 2  ;;  %v2023_v43 = vpop.eup %2022  ;;  %v1625_v18 = vrot.slane %v2767_v54, 2  ;;  %v1376_v51 = vsel %vm1186_vm14, %v1374_v40, %v1375_v0 }
 0x20f   : > { %2028 = vpow2.f32 %v1891_v42  ;;  %v1451_v20 = vrot.slane %v1414_v45, 2  ;;  %v1626_v46 = vrot.slane %v2770_v41, 2  ;;  %v1396_v24 = vadd.f32 %v1376_v51, %v1320_v2 }
 0x210   : > { %v1397_v29 = vadd.f32 %v2602_v55, %v1321_v21  ;;  %v1483_v28 = vmul.f32 %v2520_v47, %v2805_v8  ;;  %v1896_v35 = vmul.f32 -1.442695, %v2826_v27  ;;  %v1507_v57 = vmul.f32 %v2484_v1, %v2805_v8 }
 0x211   : > { %v1452_v62 = vsel %vm952_vm4, %v1450_v31, %v1451_v20  ;;  %v1508_v15 = vmul.f32 %v2484_v1, %v2814_v17  ;;  %v1484_v41 = vmul.f32 %v2520_v47, %v2515_v38  ;;  %v1583_v4 = vmul.f32 %v2493_v16, %v2805_v8 }
 0x212   : > { %v1472_v54 = vadd.f32 %v1452_v62, %v1396_v24  ;;  %v1473_v63 = vadd.f32 %v2611_v37, %v1397_v29  ;;  %v1491_v55 = vadd.f32 %v1483_v28, %v1471_v49  ;;  %v1543_v53 = vrot.slane %v1507_v57, 1 }
 0x213   : > { %v1544_v58 = vrot.slane %v1508_v15, 1  ;;  %v1584_v52 = vmul.f32 %v2493_v16, %v2814_v17  ;;  %v2933_v59 = vrot.slane %v2583_v34, 1  ;;  %v1551_v38 = vsel %vm1186_vm14, %v1549_v12, %v1550_v6 }
 0x214   : > { %v1492_v47 = vadd.f32 %v1484_v41, %v1472_v54  ;;  %v1493_v37 = vadd.f32 %v2754_v33, %v1473_v63  ;;  %v1689_v10 = vadd.f32 1.0, %v2023_v43  ;;  %v1619_v32 = vrot.slane %v1583_v4, 2 }
 0x215   : > { %v1548_v1 = vsel %vm1186_vm14, %v2933_v59, %v1547_v5  ;;  %v1545_v8 = vsel %vm1186_vm14, %v1543_v53, %v1544_v58  ;;  %v1620_v16 = vrot.slane %v1584_v52, 2  ;;  %v2934_v5 = vrot.slane %v2633_v23, 2 }
 0x216   : > { %v1567_v17 = vadd.f32 %v1545_v8, %v1491_v55  ;;  %v1568_v36 = vadd.f32 %v1548_v1, %v1492_v47  ;;  %v1569_v25 = vadd.f32 %v1551_v38, %v1493_v37  ;;  %v2935_v11 = vrot.slane %v2624_v30, 2 }
 0x217   : > { %v2025_v34 = vpop.eup %2024  ;;  %v1627_v12 = vsel %vm952_vm4, %v1625_v18, %v1626_v46  ;;  %2030 = vpow2.f32 %v1896_v35  ;;  %v1621_v33 = vsel %vm952_vm4, %v1619_v32, %v1620_v16 }
 0x218   : > { %v1624_v3 = vsel %vm952_vm4, %v2935_v11, %v2934_v5  ;;  %v2027_v6 = vpop.eup %2026  ;;  %v1686_v7 = vadd.f32 1.0, %v2025_v34  ;;  %v1643_v9 = vadd.f32 %v1621_v33, %v1567_v17  ;;  %v1645_v56 = vadd.f32 %v1627_v12, %v1569_v25 }
 0x219   : > { %v1644_v2 = vadd.f32 %v1624_v3, %v1568_v36  ;;  %v2029_v26 = vpop.eup %2028  ;;  %2032 = vrcp.f32 %v1689_v10  ;;  %v1687_v39 = vadd.f32 1.0, %v2027_v6 }
 0x21a   : > { %v1688_v48 = vadd.f32 1.0, %v2029_v26  ;;  %2034 = vrcp.f32 %v1686_v7  ;;  %v1658_v30 = vadd.f32 %v2776_v61, %v1643_v9  ;;  %v1660_v13 = vadd.f32 %v2776_v61, %v1645_v56 }
 0x21b   : > { %v1659_v23 = vadd.f32 %v2776_v61, %v1644_v2  ;;  %2036 = vrcp.f32 %v1687_v39 }
 0x21c   : > { %2038 = vrcp.f32 %v1688_v48  ;;  %v1893_v60 = vmul.f32 -1.442695, %v1658_v30  ;;  %v1895_v50 = vmul.f32 -1.442695, %v1660_v13 }
 0x21d   : > { %v1894_v40 = vmul.f32 -1.442695, %v1659_v23 }
 0x21e   : > { %2040 = vpow2.f32 %v1893_v60 }
 0x21f   : > { %2042 = vpow2.f32 %v1894_v40 }
 0x220   : > { %2044 = vpow2.f32 %v1895_v50 }
 0x221   : > { %v2031_v42 = vpop.eup %2030 }
 0x222   : > { %v1693_v49 = vadd.f32 1.0, %v2031_v42 }
 0x223   : > { %v2033_v0 = vpop.eup %2032 }
 0x224   : > { %v2035_v45 = vpop.eup %2034  ;;  %v1713_v61 = vmul.f32 %v2033_v0, %v2783_v14  ;;  %2046 = vrcp.f32 %v1693_v49 }
 0x225   : > { %v2037_v21 = vpop.eup %2036  ;;  %v1710_v43 = vmul.f32 %v2035_v45, %v2844_v19 }
 0x226   : > { %v2039_v31 = vpop.eup %2038  ;;  %v1711_v18 = vmul.f32 %v2037_v21, %v2847_v44 }
 0x227   : > { %v1712_v51 = vmul.f32 %v2039_v31, %v2855_v22 }
 0x228   : > { %v2041_v20 = vpop.eup %2040  ;;  %v1903_v46 = vpack.c.bf16 %v1711_v18, %v1710_v43 }
 0x229   : > { %v2043_v24 = vpop.eup %2042  ;;  %v1908_v29 = vpack.c.bf16 %v1713_v61, %v1712_v51  ;;  %v1690_v28 = vadd.f32 1.0, %v2041_v20 }
 0x22a   : > { %v2045_v35 = vpop.eup %2044  ;;  %1904 = vst [vmem:[%s365_s23] sm:$0xff] %v1903_v46   ;;  %v1691_v62 = vadd.f32 1.0, %v2043_v24 }
 0x22b   : > { %1920 = vst [vmem:[%s365_s23 + $0x8] sm:$0xff] %v1908_v29   ;;  %v1692_v19 = vadd.f32 1.0, %v2045_v35  ;;  %2048 = vrcp.f32 %v1690_v28 }
 0x22c   : > { %2050 = vrcp.f32 %v1691_v62 }
 0x22d   : > { %2052 = vrcp.f32 %v1692_v19 }
 0x22e   : > { %v2047_v44 = vpop.eup %2046 }
 0x22f   : > { %v1717_v63 = vmul.f32 %v2047_v44, %v2826_v27 }
 0x235   : > { %v2049_v57 = vpop.eup %2048 }
 0x236   : > { %v2051_v15 = vpop.eup %2050  ;;  %v1714_v14 = vmul.f32 %v2049_v57, %v1658_v30 }
 0x237   : > { %v2053_v54 = vpop.eup %2052  ;;  %v1715_v22 = vmul.f32 %v2051_v15, %v1659_v23 }
 0x238   : > { %v1716_v41 = vmul.f32 %v2053_v54, %v1660_v13 }
 0x239   : > { %v1913_v55 = vpack.c.bf16 %v1715_v22, %v1714_v14 }
 0x23a   : > { %v1918_v53 = vpack.c.bf16 %v1717_v63, %v1716_v41 }
 0x23b   : > { %1921 = vst [vmem:[%s365_s23 + $0x10] sm:$0xff] %v1913_v55  }
 0x23c   : > { %1922 = vst [vmem:[%s365_s23 + $0x18] sm:$0xff] %v1918_v53  }
 0x23d PF: > { %s18_s27 = sadd.s32 1, %s2060_s27  }
 0x23e   : > { %p15_p4 = scmp.ge.s32.totalorder %s18_s27, 4  }
 0x240   :  { %17 = sbr.rel (!%p15_p4) target bundleno = 1 (0x1), region = 92 }

</bundles_post_ra>
